<compile_context>
chip_gen: v5e
topology: v5e:2x2
jax: 0.10.0
libtpu: 0.0.40
codegen_flags: <defaults>
</compile_context>

<pallas_src>
import functools

import jax
import jax.numpy as jnp
from jax.experimental import pallas as pl
from jax.experimental.pallas import tpu as pltpu


def _round_up(x, m):
    return (x + m - 1) // m * m


# --------------------------------------------------------------- kernel A ---
def lstm_kernel(x_ref, wih_ref, whh_ref, b_ref, h_out_ref, gx_sc,
                *, seq_len, batch_p, hidden_p):
    """Whole-sequence LSTM recurrence, single invocation, fully VMEM-resident.

    x_ref    : (T*Bp, Fp)  bf16  time-major flattened features
    wih_ref  : (Fp, 4Hp)   bf16  W_ih^T (per-gate padded)
    whh_ref  : (Hp, 4Hp)   f32   W_hh^T (kept f32: feeds the serial recurrence)
    b_ref    : (1, 4Hp)    f32   b_ih + b_hh
    h_out_ref: (T*Bp, Hp)  f32   all hidden states (consumed by the fc kernel)
    gx_sc    : (T*Bp, 4Hp) f32   staged input projection
    """
    T, Bp, Hp = seq_len, batch_p, hidden_p

    # (1) Hoisted input projection for ALL timesteps: one bf16 MXU matmul.
    gx_sc[...] = (jnp.dot(x_ref[...], wih_ref[...],
                          preferred_element_type=jnp.float32) + b_ref[...])

    # (2) Serial recurrence: only h_{t-1} @ W_hh^T + gate math per step.
    #     Carries and gate nonlinearities stay f32 so rounding does not
    #     compound over T.
    def step(t, carry):
        h_prev, c_prev = carry
        row = pl.multiple_of(t * Bp, Bp)
        gates = gx_sc[pl.ds(row, Bp), :] + jnp.dot(
            h_prev, whh_ref[...], preferred_element_type=jnp.float32)
        # PyTorch gate order: i, f, g, o.  Hp is a multiple of 128 -> each
        # slice is a full lane-aligned block.
        i_g = jax.nn.sigmoid(gates[:, 0 * Hp:1 * Hp])
        f_g = jax.nn.sigmoid(gates[:, 1 * Hp:2 * Hp])
        g_g = jnp.tanh(gates[:, 2 * Hp:3 * Hp])
        o_g = jax.nn.sigmoid(gates[:, 3 * Hp:4 * Hp])
        c_new = f_g * c_prev + i_g * g_g
        h_new = o_g * jnp.tanh(c_new)
        h_out_ref[pl.ds(row, Bp), :] = h_new
        return (h_new, c_new)

    zeros = jnp.zeros((Bp, Hp), jnp.float32)  # torch.nn.LSTM default hidden=None
    # unroll=True: per-step work is a tiny (Bp, Hp)x(Hp, 4Hp) matmul, so loop
    # bookkeeping sits on the critical path.  For Hp >= 512 prefer unroll=2..4.
    jax.lax.fori_loop(0, T, step, (zeros, zeros), unroll=True)


# --------------------------------------------------------------- kernel B ---
def fc_kernel(h_ref, wfc_ref, bfc_ref, out_ref):
    """One (row_tile, Hp) @ (Hp, v_tile) bf16 matmul tile of fc(h)."""
    h = h_ref[...].astype(jnp.bfloat16)
    out_ref[...] = (jnp.dot(h, wfc_ref[...],
                            preferred_element_type=jnp.float32)
                    + bfc_ref[...]).astype(out_ref.dtype)


# --------------------------------------------------------------- wrapper ----
def prepare_caption_decoder_params(params):
    """Pad / transpose / cast the weights ONCE (not per forward call)."""
    f32, bf16 = jnp.float32, jnp.bfloat16
    H = params["w_hh"].shape[1]          # w_hh: (4H, H)
    F = params["w_ih"].shape[1]          # w_ih: (4H, F)
    V = params["w_fc"].shape[0]          # w_fc: (V, H)
    Fp, Hp, Vp = _round_up(F, 128), _round_up(H, 128), _round_up(V, 128)

    w_ih = params["w_ih"].astype(f32).reshape(4, H, F)
    wih_t = (jnp.zeros((4, Hp, Fp), f32).at[:, :H, :F].set(w_ih)
             .reshape(4 * Hp, Fp).T.astype(bf16))               # (Fp, 4Hp) bf16

    w_hh = params["w_hh"].astype(f32).reshape(4, H, H)
    whh_t = (jnp.zeros((4, Hp, Hp), f32).at[:, :H, :H].set(w_hh)
             .reshape(4 * Hp, Hp).T)                            # (Hp, 4Hp) f32

    b = (params["b_ih"] + params["b_hh"]).astype(f32).reshape(4, H)
    bias = jnp.zeros((4, Hp), f32).at[:, :H].set(b).reshape(1, 4 * Hp)

    wfc_t = (jnp.zeros((Hp, Vp), f32)
             .at[:H, :V].set(params["w_fc"].astype(f32).T).astype(bf16))
    bfc = jnp.zeros((1, Vp), f32).at[0, :V].set(params["b_fc"].astype(f32))

    return {"wih_t": wih_t, "whh_t": whh_t, "bias": bias,
            "wfc_t": wfc_t, "bfc": bfc, "dims": (F, H, V, Fp, Hp, Vp)}


def caption_decoder_forward(features, prep):
    """features: (B, T, F) batch_first, like the PyTorch module.  -> (B, T, V)."""
    F, H, V, Fp, Hp, Vp = prep["dims"]
    B, T, F_in = features.shape
    assert F_in == F
    Bp = _round_up(B, 8)
    f32, bf16 = jnp.float32, jnp.bfloat16

    # Time-major, zero-padded, flattened, bf16 input: (T*Bp, Fp).
    x = jnp.zeros((T, Bp, Fp), bf16).at[:, :B, :F].set(
        jnp.transpose(features, (1, 0, 2)).astype(bf16))
    x2d = x.reshape(T * Bp, Fp)

    # ---- Kernel A: recurrence (resident, single-buffered, one invocation) ----
    bytes_a = (x2d.size * 2 + prep["wih_t"].size * 2 + prep["whh_t"].size * 4
               + prep["bias"].size * 4 + T * Bp * Hp * 4 + T * Bp * 4 * Hp * 4)
    vmem_a = min(max(2 * bytes_a, 32 * 1024 * 1024), 64 * 1024 * 1024)

    h_all = pl.pallas_call(
        functools.partial(lstm_kernel, seq_len=T, batch_p=Bp, hidden_p=Hp),
        out_shape=jax.ShapeDtypeStruct((T * Bp, Hp), f32),
        in_specs=[pl.BlockSpec(memory_space=pltpu.MemorySpace.VMEM)] * 4,
        out_specs=pl.BlockSpec(memory_space=pltpu.MemorySpace.VMEM),
        scratch_shapes=[pltpu.VMEM((T * Bp, 4 * Hp), f32)],
        compiler_params=pltpu.CompilerParams(vmem_limit_bytes=vmem_a),
    )(x2d, prep["wih_t"], prep["whh_t"], prep["bias"])

    # ---- Kernel B: vocab projection, conventionally tiled, fully parallel ----
    tn = 512 if Vp % 512 == 0 else (256 if Vp % 256 == 0 else 128)
    Tm = next(d for d in range(T, 0, -1) if T % d == 0 and Bp * d <= 512)
    tm = Bp * Tm

    out2d = pl.pallas_call(
        fc_kernel,
        out_shape=jax.ShapeDtypeStruct((T * Bp, Vp), f32),
        grid=(Vp // tn, T // Tm),
        in_specs=[
            pl.BlockSpec((tm, Hp), lambda j, i: (i, 0)),   # h rows (time-major)
            pl.BlockSpec((Hp, tn), lambda j, i: (0, j)),   # W_fc^T column tile
            pl.BlockSpec((1, tn), lambda j, i: (0, j)),    # b_fc tile
        ],
        out_specs=pl.BlockSpec((tm, tn), lambda j, i: (i, j)),
        compiler_params=pltpu.CompilerParams(
            dimension_semantics=("parallel", "parallel")),
    )(h_all, prep["wfc_t"], prep["bfc"])

    # Slice off padding; final (T,B,V)->(B,T,V) transpose kept outside the
    # kernel (a batch-major out block would need a size-1 second-to-last block
    # dim, which breaks the (8,128) store alignment).
    out = out2d.reshape(T, Bp, Vp)[:, :B, :V]
    return jnp.transpose(out, (1, 0, 2))


# ------------------------------------------------------------- reference ----
def caption_decoder_reference(features, params):
    """Pure-JAX f32 reference (lax.scan) matching torch.nn.LSTM + Linear."""
    H = params["w_hh"].shape[1]
    wih_t = params["w_ih"].T
    whh_t = params["w_hh"].T
    bias = params["b_ih"] + params["b_hh"]

    def step(carry, x_t):
        h, c = carry
        gates = x_t @ wih_t + h @ whh_t + bias
        i_g = jax.nn.sigmoid(gates[:, 0 * H:1 * H])
        f_g = jax.nn.sigmoid(gates[:, 1 * H:2 * H])
        g_g = jnp.tanh(gates[:, 2 * H:3 * H])
        o_g = jax.nn.sigmoid(gates[:, 3 * H:4 * H])
        c_new = f_g * c + i_g * g_g
        h_new = o_g * jnp.tanh(c_new)
        return (h_new, c_new), h_new

    B = features.shape[0]
    h0 = jnp.zeros((B, H), jnp.float32)
    c0 = jnp.zeros((B, H), jnp.float32)
    _, hs = jax.lax.scan(step, (h0, c0), jnp.transpose(features, (1, 0, 2)))
    hs = jnp.transpose(hs, (1, 0, 2))                       # (B, T, H)
    return hs @ params["w_fc"].T + params["b_fc"]           # (B, T, V)


if __name__ == "__main__":
    # Small shapes consistent with the module; deliberately not tile-aligned so
    # the padding path (B->8, F/H/V->128) is exercised.
    B, T = 4, 8
    feature_dim, hidden_dim, vocab_size = 64, 96, 200

    key = jax.random.PRNGKey(0)
    keys = jax.random.split(key, 7)
    scale = 0.1
    params = {
        "w_ih": scale * jax.random.normal(keys[0], (4 * hidden_dim, feature_dim), jnp.float32),
        "w_hh": scale * jax.random.normal(keys[1], (4 * hidden_dim, hidden_dim), jnp.float32),
        "b_ih": scale * jax.random.normal(keys[2], (4 * hidden_dim,), jnp.float32),
        "b_hh": scale * jax.random.normal(keys[3], (4 * hidden_dim,), jnp.float32),
        "w_fc": scale * jax.random.normal(keys[4], (vocab_size, hidden_dim), jnp.float32),
        "b_fc": scale * jax.random.normal(keys[5], (vocab_size,), jnp.float32),
    }
    features = jax.random.normal(keys[6], (B, T, feature_dim), jnp.float32)

    prep = prepare_caption_decoder_params(params)   # one-time weight prep
    out = caption_decoder_forward(features, prep)
    out = jax.block_until_ready(out)

    ref = caption_decoder_reference(features, params)
    assert out.shape == (B, T, vocab_size), out.shape
    max_err = float(jnp.max(jnp.abs(out - ref)))
    # bf16 operands on the two large matmuls -> looser tolerance than pure f32.
    assert jnp.allclose(out, ref, atol=3e-2, rtol=3e-2), max_err

    print("KERNEL_OK")
</pallas_src>

<mosaic_0001>
module attributes {stable_mosaic.version = 11 : i64} {
  func.func @lstm_kernel(%arg0: memref<64x128xbf16, #tpu.memory_space<vmem>>, %arg1: memref<128x512xbf16, #tpu.memory_space<vmem>>, %arg2: memref<128x512xf32, #tpu.memory_space<vmem>>, %arg3: memref<1x512xf32, #tpu.memory_space<vmem>>, %arg4: memref<64x128xf32, #tpu.memory_space<vmem>>, %arg5: memref<64x512xf32, #tpu.memory_space<vmem>>) attributes {dimension_semantics = [], scalar_prefetch = 0 : i64, scratch_operands = 1 : i64, tpu.core_type = #tpu.core_type<tc>} {
    %c0 = arith.constant 0 : index
    %c0_0 = arith.constant 0 : index
    %0 = vector.load %arg0[%c0, %c0_0] : memref<64x128xbf16, #tpu.memory_space<vmem>>, vector<64x128xbf16>
    %c0_1 = arith.constant 0 : index
    %c0_2 = arith.constant 0 : index
    %1 = vector.load %arg1[%c0_1, %c0_2] : memref<128x512xbf16, #tpu.memory_space<vmem>>, vector<128x512xbf16>
    %cst = arith.constant dense<0.000000e+00> : vector<64x512xf32>
    %2 = tpu.matmul %0, %1, %cst {dimension_numbers = #tpu.dot_dimension_numbers<[1], [0], [0], [1], [0, 0, 1, 1], [], []>} : vector<64x128xbf16>, vector<128x512xbf16>, vector<64x512xf32> -> vector<64x512xf32>
    %c0_3 = arith.constant 0 : index
    %c0_4 = arith.constant 0 : index
    %3 = vector.load %arg3[%c0_3, %c0_4] : memref<1x512xf32, #tpu.memory_space<vmem>>, vector<1x512xf32>
    %4 = vector.broadcast %3 : vector<1x512xf32> to vector<64x512xf32>
    %5 = arith.addf %2, %4 : vector<64x512xf32>
    %c0_5 = arith.constant 0 : index
    %c0_6 = arith.constant 0 : index
    %6 = vector.load %arg5[%c0_5, %c0_6] : memref<64x512xf32, #tpu.memory_space<vmem>>, vector<64x512xf32>
    tpu.vector_store %arg5[%c0_5, %c0_6], %5 {strides = array<i32>} : memref<64x512xf32, #tpu.memory_space<vmem>>, vector<64x512xf32>,
    %cst_7 = arith.constant 0.000000e+00 : f32
    %7 = vector.broadcast %cst_7 : f32 to vector<8x128xf32>
    %c0_i32 = arith.constant 0 : i32
    %c8_i32 = arith.constant 8 : i32
    %8 = arith.muli %c0_i32, %c8_i32 : i32
    %9 = tpu.assume_multiple %8, 8 : i32
    %10 = arith.index_cast %9 : i32 to index
    %c0_8 = arith.constant 0 : index
    %11 = vector.load %arg5[%10, %c0_8] : memref<64x512xf32, #tpu.memory_space<vmem>>, vector<8x512xf32>
    %c0_9 = arith.constant 0 : index
    %c0_10 = arith.constant 0 : index
    %12 = vector.load %arg2[%c0_9, %c0_10] : memref<128x512xf32, #tpu.memory_space<vmem>>, vector<128x512xf32>
    %cst_11 = arith.constant dense<0.000000e+00> : vector<8x512xf32>
    %13 = tpu.matmul %7, %12, %cst_11 {dimension_numbers = #tpu.dot_dimension_numbers<[1], [0], [0], [1], [0, 0, 1, 1], [], []>} : vector<8x128xf32>, vector<128x512xf32>, vector<8x512xf32> -> vector<8x512xf32>
    %14 = arith.addf %11, %13 : vector<8x512xf32>
    %15 = vector.extract_strided_slice %14 {offsets = [0, 0], sizes = [8, 128], strides = [1, 1]} : vector<8x512xf32> to vector<8x128xf32>
    %16 = arith.negf %15 : vector<8x128xf32>
    %17 = math.exp %16 : vector<8x128xf32>
    %cst_12 = arith.constant 1.000000e+00 : f32
    %18 = vector.broadcast %cst_12 : f32 to vector<8x128xf32>
    %19 = arith.addf %18, %17 : vector<8x128xf32>
    %20 = arith.divf %18, %19 : vector<8x128xf32>
    %21 = vector.extract_strided_slice %14 {offsets = [0, 128], sizes = [8, 128], strides = [1, 1]} : vector<8x512xf32> to vector<8x128xf32>
    %22 = arith.negf %21 : vector<8x128xf32>
    %23 = math.exp %22 : vector<8x128xf32>
    %cst_13 = arith.constant 1.000000e+00 : f32
    %24 = vector.broadcast %cst_13 : f32 to vector<8x128xf32>
    %25 = arith.addf %24, %23 : vector<8x128xf32>
    %26 = arith.divf %24, %25 : vector<8x128xf32>
    %27 = vector.extract_strided_slice %14 {offsets = [0, 256], sizes = [8, 128], strides = [1, 1]} : vector<8x512xf32> to vector<8x128xf32>
    %28 = math.tanh %27 : vector<8x128xf32>
    %29 = vector.extract_strided_slice %14 {offsets = [0, 384], sizes = [8, 128], strides = [1, 1]} : vector<8x512xf32> to vector<8x128xf32>
    %30 = arith.negf %29 : vector<8x128xf32>
    %31 = math.exp %30 : vector<8x128xf32>
    %cst_14 = arith.constant 1.000000e+00 : f32
    %32 = vector.broadcast %cst_14 : f32 to vector<8x128xf32>
    %33 = arith.addf %32, %31 : vector<8x128xf32>
    %34 = arith.divf %32, %33 : vector<8x128xf32>
    %35 = arith.mulf %26, %7 : vector<8x128xf32>
    %36 = arith.mulf %20, %28 : vector<8x128xf32>
    %37 = arith.addf %35, %36 : vector<8x128xf32>
    %38 = math.tanh %37 : vector<8x128xf32>
    %39 = arith.mulf %34, %38 : vector<8x128xf32>
    %40 = arith.index_cast %9 : i32 to index
    %c0_15 = arith.constant 0 : index
    %41 = vector.load %arg4[%40, %c0_15] : memref<64x128xf32, #tpu.memory_space<vmem>>, vector<8x128xf32>
    tpu.vector_store %arg4[%40, %c0_15], %39 {strides = array<i32>} : memref<64x128xf32, #tpu.memory_space<vmem>>, vector<8x128xf32>,
    %c1_i32 = arith.constant 1 : i32
    %c8_i32_16 = arith.constant 8 : i32
    %42 = arith.muli %c1_i32, %c8_i32_16 : i32
    %43 = tpu.assume_multiple %42, 8 : i32
    %44 = arith.index_cast %43 : i32 to index
    %c0_17 = arith.constant 0 : index
    %45 = vector.load %arg5[%44, %c0_17] : memref<64x512xf32, #tpu.memory_space<vmem>>, vector<8x512xf32>
    %c0_18 = arith.constant 0 : index
    %c0_19 = arith.constant 0 : index
    %46 = vector.load %arg2[%c0_18, %c0_19] : memref<128x512xf32, #tpu.memory_space<vmem>>, vector<128x512xf32>
    %cst_20 = arith.constant dense<0.000000e+00> : vector<8x512xf32>
    %47 = tpu.matmul %39, %46, %cst_20 {dimension_numbers = #tpu.dot_dimension_numbers<[1], [0], [0], [1], [0, 0, 1, 1], [], []>} : vector<8x128xf32>, vector<128x512xf32>, vector<8x512xf32> -> vector<8x512xf32>
    %48 = arith.addf %45, %47 : vector<8x512xf32>
    %49 = vector.extract_strided_slice %48 {offsets = [0, 0], sizes = [8, 128], strides = [1, 1]} : vector<8x512xf32> to vector<8x128xf32>
    %50 = arith.negf %49 : vector<8x128xf32>
    %51 = math.exp %50 : vector<8x128xf32>
    %cst_21 = arith.constant 1.000000e+00 : f32
    %52 = vector.broadcast %cst_21 : f32 to vector<8x128xf32>
    %53 = arith.addf %52, %51 : vector<8x128xf32>
    %54 = arith.divf %52, %53 : vector<8x128xf32>
    %55 = vector.extract_strided_slice %48 {offsets = [0, 128], sizes = [8, 128], strides = [1, 1]} : vector<8x512xf32> to vector<8x128xf32>
    %56 = arith.negf %55 : vector<8x128xf32>
    %57 = math.exp %56 : vector<8x128xf32>
    %cst_22 = arith.constant 1.000000e+00 : f32
    %58 = vector.broadcast %cst_22 : f32 to vector<8x128xf32>
    %59 = arith.addf %58, %57 : vector<8x128xf32>
    %60 = arith.divf %58, %59 : vector<8x128xf32>
    %61 = vector.extract_strided_slice %48 {offsets = [0, 256], sizes = [8, 128], strides = [1, 1]} : vector<8x512xf32> to vector<8x128xf32>
    %62 = math.tanh %61 : vector<8x128xf32>
    %63 = vector.extract_strided_slice %48 {offsets = [0, 384], sizes = [8, 128], strides = [1, 1]} : vector<8x512xf32> to vector<8x128xf32>
    %64 = arith.negf %63 : vector<8x128xf32>
    %65 = math.exp %64 : vector<8x128xf32>
    %cst_23 = arith.constant 1.000000e+00 : f32
    %66 = vector.broadcast %cst_23 : f32 to vector<8x128xf32>
    %67 = arith.addf %66, %65 : vector<8x128xf32>
    %68 = arith.divf %66, %67 : vector<8x128xf32>
    %69 = arith.mulf %60, %37 : vector<8x128xf32>
    %70 = arith.mulf %54, %62 : vector<8x128xf32>
    %71 = arith.addf %69, %70 : vector<8x128xf32>
    %72 = math.tanh %71 : vector<8x128xf32>
    %73 = arith.mulf %68, %72 : vector<8x128xf32>
    %74 = arith.index_cast %43 : i32 to index
    %c0_24 = arith.constant 0 : index
    %75 = vector.load %arg4[%74, %c0_24] : memref<64x128xf32, #tpu.memory_space<vmem>>, vector<8x128xf32>
    tpu.vector_store %arg4[%74, %c0_24], %73 {strides = array<i32>} : memref<64x128xf32, #tpu.memory_space<vmem>>, vector<8x128xf32>,
    %c2_i32 = arith.constant 2 : i32
    %c8_i32_25 = arith.constant 8 : i32
    %76 = arith.muli %c2_i32, %c8_i32_25 : i32
    %77 = tpu.assume_multiple %76, 8 : i32
    %78 = arith.index_cast %77 : i32 to index
    %c0_26 = arith.constant 0 : index
    %79 = vector.load %arg5[%78, %c0_26] : memref<64x512xf32, #tpu.memory_space<vmem>>, vector<8x512xf32>
    %c0_27 = arith.constant 0 : index
    %c0_28 = arith.constant 0 : index
    %80 = vector.load %arg2[%c0_27, %c0_28] : memref<128x512xf32, #tpu.memory_space<vmem>>, vector<128x512xf32>
    %cst_29 = arith.constant dense<0.000000e+00> : vector<8x512xf32>
    %81 = tpu.matmul %73, %80, %cst_29 {dimension_numbers = #tpu.dot_dimension_numbers<[1], [0], [0], [1], [0, 0, 1, 1], [], []>} : vector<8x128xf32>, vector<128x512xf32>, vector<8x512xf32> -> vector<8x512xf32>
    %82 = arith.addf %79, %81 : vector<8x512xf32>
    %83 = vector.extract_strided_slice %82 {offsets = [0, 0], sizes = [8, 128], strides = [1, 1]} : vector<8x512xf32> to vector<8x128xf32>
    %84 = arith.negf %83 : vector<8x128xf32>
    %85 = math.exp %84 : vector<8x128xf32>
    %cst_30 = arith.constant 1.000000e+00 : f32
    %86 = vector.broadcast %cst_30 : f32 to vector<8x128xf32>
    %87 = arith.addf %86, %85 : vector<8x128xf32>
    %88 = arith.divf %86, %87 : vector<8x128xf32>
    %89 = vector.extract_strided_slice %82 {offsets = [0, 128], sizes = [8, 128], strides = [1, 1]} : vector<8x512xf32> to vector<8x128xf32>
    %90 = arith.negf %89 : vector<8x128xf32>
    %91 = math.exp %90 : vector<8x128xf32>
    %cst_31 = arith.constant 1.000000e+00 : f32
    %92 = vector.broadcast %cst_31 : f32 to vector<8x128xf32>
    %93 = arith.addf %92, %91 : vector<8x128xf32>
    %94 = arith.divf %92, %93 : vector<8x128xf32>
    %95 = vector.extract_strided_slice %82 {offsets = [0, 256], sizes = [8, 128], strides = [1, 1]} : vector<8x512xf32> to vector<8x128xf32>
    %96 = math.tanh %95 : vector<8x128xf32>
    %97 = vector.extract_strided_slice %82 {offsets = [0, 384], sizes = [8, 128], strides = [1, 1]} : vector<8x512xf32> to vector<8x128xf32>
    %98 = arith.negf %97 : vector<8x128xf32>
    %99 = math.exp %98 : vector<8x128xf32>
    %cst_32 = arith.constant 1.000000e+00 : f32
    %100 = vector.broadcast %cst_32 : f32 to vector<8x128xf32>
    %101 = arith.addf %100, %99 : vector<8x128xf32>
    %102 = arith.divf %100, %101 : vector<8x128xf32>
    %103 = arith.mulf %94, %71 : vector<8x128xf32>
    %104 = arith.mulf %88, %96 : vector<8x128xf32>
    %105 = arith.addf %103, %104 : vector<8x128xf32>
    %106 = math.tanh %105 : vector<8x128xf32>
    %107 = arith.mulf %102, %106 : vector<8x128xf32>
    %108 = arith.index_cast %77 : i32 to index
    %c0_33 = arith.constant 0 : index
    %109 = vector.load %arg4[%108, %c0_33] : memref<64x128xf32, #tpu.memory_space<vmem>>, vector<8x128xf32>
    tpu.vector_store %arg4[%108, %c0_33], %107 {strides = array<i32>} : memref<64x128xf32, #tpu.memory_space<vmem>>, vector<8x128xf32>,
    %c3_i32 = arith.constant 3 : i32
    %c8_i32_34 = arith.constant 8 : i32
    %110 = arith.muli %c3_i32, %c8_i32_34 : i32
    %111 = tpu.assume_multiple %110, 8 : i32
    %112 = arith.index_cast %111 : i32 to index
    %c0_35 = arith.constant 0 : index
    %113 = vector.load %arg5[%112, %c0_35] : memref<64x512xf32, #tpu.memory_space<vmem>>, vector<8x512xf32>
    %c0_36 = arith.constant 0 : index
    %c0_37 = arith.constant 0 : index
    %114 = vector.load %arg2[%c0_36, %c0_37] : memref<128x512xf32, #tpu.memory_space<vmem>>, vector<128x512xf32>
    %cst_38 = arith.constant dense<0.000000e+00> : vector<8x512xf32>
    %115 = tpu.matmul %107, %114, %cst_38 {dimension_numbers = #tpu.dot_dimension_numbers<[1], [0], [0], [1], [0, 0, 1, 1], [], []>} : vector<8x128xf32>, vector<128x512xf32>, vector<8x512xf32> -> vector<8x512xf32>
    %116 = arith.addf %113, %115 : vector<8x512xf32>
    %117 = vector.extract_strided_slice %116 {offsets = [0, 0], sizes = [8, 128], strides = [1, 1]} : vector<8x512xf32> to vector<8x128xf32>
    %118 = arith.negf %117 : vector<8x128xf32>
    %119 = math.exp %118 : vector<8x128xf32>
    %cst_39 = arith.constant 1.000000e+00 : f32
    %120 = vector.broadcast %cst_39 : f32 to vector<8x128xf32>
    %121 = arith.addf %120, %119 : vector<8x128xf32>
    %122 = arith.divf %120, %121 : vector<8x128xf32>
    %123 = vector.extract_strided_slice %116 {offsets = [0, 128], sizes = [8, 128], strides = [1, 1]} : vector<8x512xf32> to vector<8x128xf32>
    %124 = arith.negf %123 : vector<8x128xf32>
    %125 = math.exp %124 : vector<8x128xf32>
    %cst_40 = arith.constant 1.000000e+00 : f32
    %126 = vector.broadcast %cst_40 : f32 to vector<8x128xf32>
    %127 = arith.addf %126, %125 : vector<8x128xf32>
    %128 = arith.divf %126, %127 : vector<8x128xf32>
    %129 = vector.extract_strided_slice %116 {offsets = [0, 256], sizes = [8, 128], strides = [1, 1]} : vector<8x512xf32> to vector<8x128xf32>
    %130 = math.tanh %129 : vector<8x128xf32>
    %131 = vector.extract_strided_slice %116 {offsets = [0, 384], sizes = [8, 128], strides = [1, 1]} : vector<8x512xf32> to vector<8x128xf32>
    %132 = arith.negf %131 : vector<8x128xf32>
    %133 = math.exp %132 : vector<8x128xf32>
    %cst_41 = arith.constant 1.000000e+00 : f32
    %134 = vector.broadcast %cst_41 : f32 to vector<8x128xf32>
    %135 = arith.addf %134, %133 : vector<8x128xf32>
    %136 = arith.divf %134, %135 : vector<8x128xf32>
    %137 = arith.mulf %128, %105 : vector<8x128xf32>
    %138 = arith.mulf %122, %130 : vector<8x128xf32>
    %139 = arith.addf %137, %138 : vector<8x128xf32>
    %140 = math.tanh %139 : vector<8x128xf32>
    %141 = arith.mulf %136, %140 : vector<8x128xf32>
    %142 = arith.index_cast %111 : i32 to index
    %c0_42 = arith.constant 0 : index
    %143 = vector.load %arg4[%142, %c0_42] : memref<64x128xf32, #tpu.memory_space<vmem>>, vector<8x128xf32>
    tpu.vector_store %arg4[%142, %c0_42], %141 {strides = array<i32>} : memref<64x128xf32, #tpu.memory_space<vmem>>, vector<8x128xf32>,
    %c4_i32 = arith.constant 4 : i32
    %c8_i32_43 = arith.constant 8 : i32
    %144 = arith.muli %c4_i32, %c8_i32_43 : i32
    %145 = tpu.assume_multiple %144, 8 : i32
    %146 = arith.index_cast %145 : i32 to index
    %c0_44 = arith.constant 0 : index
    %147 = vector.load %arg5[%146, %c0_44] : memref<64x512xf32, #tpu.memory_space<vmem>>, vector<8x512xf32>
    %c0_45 = arith.constant 0 : index
    %c0_46 = arith.constant 0 : index
    %148 = vector.load %arg2[%c0_45, %c0_46] : memref<128x512xf32, #tpu.memory_space<vmem>>, vector<128x512xf32>
    %cst_47 = arith.constant dense<0.000000e+00> : vector<8x512xf32>
    %149 = tpu.matmul %141, %148, %cst_47 {dimension_numbers = #tpu.dot_dimension_numbers<[1], [0], [0], [1], [0, 0, 1, 1], [], []>} : vector<8x128xf32>, vector<128x512xf32>, vector<8x512xf32> -> vector<8x512xf32>
    %150 = arith.addf %147, %149 : vector<8x512xf32>
    %151 = vector.extract_strided_slice %150 {offsets = [0, 0], sizes = [8, 128], strides = [1, 1]} : vector<8x512xf32> to vector<8x128xf32>
    %152 = arith.negf %151 : vector<8x128xf32>
    %153 = math.exp %152 : vector<8x128xf32>
    %cst_48 = arith.constant 1.000000e+00 : f32
    %154 = vector.broadcast %cst_48 : f32 to vector<8x128xf32>
    %155 = arith.addf %154, %153 : vector<8x128xf32>
    %156 = arith.divf %154, %155 : vector<8x128xf32>
    %157 = vector.extract_strided_slice %150 {offsets = [0, 128], sizes = [8, 128], strides = [1, 1]} : vector<8x512xf32> to vector<8x128xf32>
    %158 = arith.negf %157 : vector<8x128xf32>
    %159 = math.exp %158 : vector<8x128xf32>
    %cst_49 = arith.constant 1.000000e+00 : f32
    %160 = vector.broadcast %cst_49 : f32 to vector<8x128xf32>
    %161 = arith.addf %160, %159 : vector<8x128xf32>
    %162 = arith.divf %160, %161 : vector<8x128xf32>
    %163 = vector.extract_strided_slice %150 {offsets = [0, 256], sizes = [8, 128], strides = [1, 1]} : vector<8x512xf32> to vector<8x128xf32>
    %164 = math.tanh %163 : vector<8x128xf32>
    %165 = vector.extract_strided_slice %150 {offsets = [0, 384], sizes = [8, 128], strides = [1, 1]} : vector<8x512xf32> to vector<8x128xf32>
    %166 = arith.negf %165 : vector<8x128xf32>
    %167 = math.exp %166 : vector<8x128xf32>
    %cst_50 = arith.constant 1.000000e+00 : f32
    %168 = vector.broadcast %cst_50 : f32 to vector<8x128xf32>
    %169 = arith.addf %168, %167 : vector<8x128xf32>
    %170 = arith.divf %168, %169 : vector<8x128xf32>
    %171 = arith.mulf %162, %139 : vector<8x128xf32>
    %172 = arith.mulf %156, %164 : vector<8x128xf32>
    %173 = arith.addf %171, %172 : vector<8x128xf32>
    %174 = math.tanh %173 : vector<8x128xf32>
    %175 = arith.mulf %170, %174 : vector<8x128xf32>
    %176 = arith.index_cast %145 : i32 to index
    %c0_51 = arith.constant 0 : index
    %177 = vector.load %arg4[%176, %c0_51] : memref<64x128xf32, #tpu.memory_space<vmem>>, vector<8x128xf32>
    tpu.vector_store %arg4[%176, %c0_51], %175 {strides = array<i32>} : memref<64x128xf32, #tpu.memory_space<vmem>>, vector<8x128xf32>,
    %c5_i32 = arith.constant 5 : i32
    %c8_i32_52 = arith.constant 8 : i32
    %178 = arith.muli %c5_i32, %c8_i32_52 : i32
    %179 = tpu.assume_multiple %178, 8 : i32
    %180 = arith.index_cast %179 : i32 to index
    %c0_53 = arith.constant 0 : index
    %181 = vector.load %arg5[%180, %c0_53] : memref<64x512xf32, #tpu.memory_space<vmem>>, vector<8x512xf32>
    %c0_54 = arith.constant 0 : index
    %c0_55 = arith.constant 0 : index
    %182 = vector.load %arg2[%c0_54, %c0_55] : memref<128x512xf32, #tpu.memory_space<vmem>>, vector<128x512xf32>
    %cst_56 = arith.constant dense<0.000000e+00> : vector<8x512xf32>
    %183 = tpu.matmul %175, %182, %cst_56 {dimension_numbers = #tpu.dot_dimension_numbers<[1], [0], [0], [1], [0, 0, 1, 1], [], []>} : vector<8x128xf32>, vector<128x512xf32>, vector<8x512xf32> -> vector<8x512xf32>
    %184 = arith.addf %181, %183 : vector<8x512xf32>
    %185 = vector.extract_strided_slice %184 {offsets = [0, 0], sizes = [8, 128], strides = [1, 1]} : vector<8x512xf32> to vector<8x128xf32>
    %186 = arith.negf %185 : vector<8x128xf32>
    %187 = math.exp %186 : vector<8x128xf32>
    %cst_57 = arith.constant 1.000000e+00 : f32
    %188 = vector.broadcast %cst_57 : f32 to vector<8x128xf32>
    %189 = arith.addf %188, %187 : vector<8x128xf32>
    %190 = arith.divf %188, %189 : vector<8x128xf32>
    %191 = vector.extract_strided_slice %184 {offsets = [0, 128], sizes = [8, 128], strides = [1, 1]} : vector<8x512xf32> to vector<8x128xf32>
    %192 = arith.negf %191 : vector<8x128xf32>
    %193 = math.exp %192 : vector<8x128xf32>
    %cst_58 = arith.constant 1.000000e+00 : f32
    %194 = vector.broadcast %cst_58 : f32 to vector<8x128xf32>
    %195 = arith.addf %194, %193 : vector<8x128xf32>
    %196 = arith.divf %194, %195 : vector<8x128xf32>
    %197 = vector.extract_strided_slice %184 {offsets = [0, 256], sizes = [8, 128], strides = [1, 1]} : vector<8x512xf32> to vector<8x128xf32>
    %198 = math.tanh %197 : vector<8x128xf32>
    %199 = vector.extract_strided_slice %184 {offsets = [0, 384], sizes = [8, 128], strides = [1, 1]} : vector<8x512xf32> to vector<8x128xf32>
    %200 = arith.negf %199 : vector<8x128xf32>
    %201 = math.exp %200 : vector<8x128xf32>
    %cst_59 = arith.constant 1.000000e+00 : f32
    %202 = vector.broadcast %cst_59 : f32 to vector<8x128xf32>
    %203 = arith.addf %202, %201 : vector<8x128xf32>
    %204 = arith.divf %202, %203 : vector<8x128xf32>
    %205 = arith.mulf %196, %173 : vector<8x128xf32>
    %206 = arith.mulf %190, %198 : vector<8x128xf32>
    %207 = arith.addf %205, %206 : vector<8x128xf32>
    %208 = math.tanh %207 : vector<8x128xf32>
    %209 = arith.mulf %204, %208 : vector<8x128xf32>
    %210 = arith.index_cast %179 : i32 to index
    %c0_60 = arith.constant 0 : index
    %211 = vector.load %arg4[%210, %c0_60] : memref<64x128xf32, #tpu.memory_space<vmem>>, vector<8x128xf32>
    tpu.vector_store %arg4[%210, %c0_60], %209 {strides = array<i32>} : memref<64x128xf32, #tpu.memory_space<vmem>>, vector<8x128xf32>,
    %c6_i32 = arith.constant 6 : i32
    %c8_i32_61 = arith.constant 8 : i32
    %212 = arith.muli %c6_i32, %c8_i32_61 : i32
    %213 = tpu.assume_multiple %212, 8 : i32
    %214 = arith.index_cast %213 : i32 to index
    %c0_62 = arith.constant 0 : index
    %215 = vector.load %arg5[%214, %c0_62] : memref<64x512xf32, #tpu.memory_space<vmem>>, vector<8x512xf32>
    %c0_63 = arith.constant 0 : index
    %c0_64 = arith.constant 0 : index
    %216 = vector.load %arg2[%c0_63, %c0_64] : memref<128x512xf32, #tpu.memory_space<vmem>>, vector<128x512xf32>
    %cst_65 = arith.constant dense<0.000000e+00> : vector<8x512xf32>
    %217 = tpu.matmul %209, %216, %cst_65 {dimension_numbers = #tpu.dot_dimension_numbers<[1], [0], [0], [1], [0, 0, 1, 1], [], []>} : vector<8x128xf32>, vector<128x512xf32>, vector<8x512xf32> -> vector<8x512xf32>
    %218 = arith.addf %215, %217 : vector<8x512xf32>
    %219 = vector.extract_strided_slice %218 {offsets = [0, 0], sizes = [8, 128], strides = [1, 1]} : vector<8x512xf32> to vector<8x128xf32>
    %220 = arith.negf %219 : vector<8x128xf32>
    %221 = math.exp %220 : vector<8x128xf32>
    %cst_66 = arith.constant 1.000000e+00 : f32
    %222 = vector.broadcast %cst_66 : f32 to vector<8x128xf32>
    %223 = arith.addf %222, %221 : vector<8x128xf32>
    %224 = arith.divf %222, %223 : vector<8x128xf32>
    %225 = vector.extract_strided_slice %218 {offsets = [0, 128], sizes = [8, 128], strides = [1, 1]} : vector<8x512xf32> to vector<8x128xf32>
    %226 = arith.negf %225 : vector<8x128xf32>
    %227 = math.exp %226 : vector<8x128xf32>
    %cst_67 = arith.constant 1.000000e+00 : f32
    %228 = vector.broadcast %cst_67 : f32 to vector<8x128xf32>
    %229 = arith.addf %228, %227 : vector<8x128xf32>
    %230 = arith.divf %228, %229 : vector<8x128xf32>
    %231 = vector.extract_strided_slice %218 {offsets = [0, 256], sizes = [8, 128], strides = [1, 1]} : vector<8x512xf32> to vector<8x128xf32>
    %232 = math.tanh %231 : vector<8x128xf32>
    %233 = vector.extract_strided_slice %218 {offsets = [0, 384], sizes = [8, 128], strides = [1, 1]} : vector<8x512xf32> to vector<8x128xf32>
    %234 = arith.negf %233 : vector<8x128xf32>
    %235 = math.exp %234 : vector<8x128xf32>
    %cst_68 = arith.constant 1.000000e+00 : f32
    %236 = vector.broadcast %cst_68 : f32 to vector<8x128xf32>
    %237 = arith.addf %236, %235 : vector<8x128xf32>
    %238 = arith.divf %236, %237 : vector<8x128xf32>
    %239 = arith.mulf %230, %207 : vector<8x128xf32>
    %240 = arith.mulf %224, %232 : vector<8x128xf32>
    %241 = arith.addf %239, %240 : vector<8x128xf32>
    %242 = math.tanh %241 : vector<8x128xf32>
    %243 = arith.mulf %238, %242 : vector<8x128xf32>
    %244 = arith.index_cast %213 : i32 to index
    %c0_69 = arith.constant 0 : index
    %245 = vector.load %arg4[%244, %c0_69] : memref<64x128xf32, #tpu.memory_space<vmem>>, vector<8x128xf32>
    tpu.vector_store %arg4[%244, %c0_69], %243 {strides = array<i32>} : memref<64x128xf32, #tpu.memory_space<vmem>>, vector<8x128xf32>,
    %c7_i32 = arith.constant 7 : i32
    %c8_i32_70 = arith.constant 8 : i32
    %246 = arith.muli %c7_i32, %c8_i32_70 : i32
    %247 = tpu.assume_multiple %246, 8 : i32
    %248 = arith.index_cast %247 : i32 to index
    %c0_71 = arith.constant 0 : index
    %249 = vector.load %arg5[%248, %c0_71] : memref<64x512xf32, #tpu.memory_space<vmem>>, vector<8x512xf32>
    %c0_72 = arith.constant 0 : index
    %c0_73 = arith.constant 0 : index
    %250 = vector.load %arg2[%c0_72, %c0_73] : memref<128x512xf32, #tpu.memory_space<vmem>>, vector<128x512xf32>
    %cst_74 = arith.constant dense<0.000000e+00> : vector<8x512xf32>
    %251 = tpu.matmul %243, %250, %cst_74 {dimension_numbers = #tpu.dot_dimension_numbers<[1], [0], [0], [1], [0, 0, 1, 1], [], []>} : vector<8x128xf32>, vector<128x512xf32>, vector<8x512xf32> -> vector<8x512xf32>
    %252 = arith.addf %249, %251 : vector<8x512xf32>
    %253 = vector.extract_strided_slice %252 {offsets = [0, 0], sizes = [8, 128], strides = [1, 1]} : vector<8x512xf32> to vector<8x128xf32>
    %254 = arith.negf %253 : vector<8x128xf32>
    %255 = math.exp %254 : vector<8x128xf32>
    %cst_75 = arith.constant 1.000000e+00 : f32
    %256 = vector.broadcast %cst_75 : f32 to vector<8x128xf32>
    %257 = arith.addf %256, %255 : vector<8x128xf32>
    %258 = arith.divf %256, %257 : vector<8x128xf32>
    %259 = vector.extract_strided_slice %252 {offsets = [0, 128], sizes = [8, 128], strides = [1, 1]} : vector<8x512xf32> to vector<8x128xf32>
    %260 = arith.negf %259 : vector<8x128xf32>
    %261 = math.exp %260 : vector<8x128xf32>
    %cst_76 = arith.constant 1.000000e+00 : f32
    %262 = vector.broadcast %cst_76 : f32 to vector<8x128xf32>
    %263 = arith.addf %262, %261 : vector<8x128xf32>
    %264 = arith.divf %262, %263 : vector<8x128xf32>
    %265 = vector.extract_strided_slice %252 {offsets = [0, 256], sizes = [8, 128], strides = [1, 1]} : vector<8x512xf32> to vector<8x128xf32>
    %266 = math.tanh %265 : vector<8x128xf32>
    %267 = vector.extract_strided_slice %252 {offsets = [0, 384], sizes = [8, 128], strides = [1, 1]} : vector<8x512xf32> to vector<8x128xf32>
    %268 = arith.negf %267 : vector<8x128xf32>
    %269 = math.exp %268 : vector<8x128xf32>
    %cst_77 = arith.constant 1.000000e+00 : f32
    %270 = vector.broadcast %cst_77 : f32 to vector<8x128xf32>
    %271 = arith.addf %270, %269 : vector<8x128xf32>
    %272 = arith.divf %270, %271 : vector<8x128xf32>
    %273 = arith.mulf %264, %241 : vector<8x128xf32>
    %274 = arith.mulf %258, %266 : vector<8x128xf32>
    %275 = arith.addf %273, %274 : vector<8x128xf32>
    %276 = math.tanh %275 : vector<8x128xf32>
    %277 = arith.mulf %272, %276 : vector<8x128xf32>
    %278 = arith.index_cast %247 : i32 to index
    %c0_78 = arith.constant 0 : index
    %279 = vector.load %arg4[%278, %c0_78] : memref<64x128xf32, #tpu.memory_space<vmem>>, vector<8x128xf32>
    tpu.vector_store %arg4[%278, %c0_78], %277 {strides = array<i32>} : memref<64x128xf32, #tpu.memory_space<vmem>>, vector<8x128xf32>,
    %c8_i32_79 = arith.constant 8 : i32
    return
  }
}

</mosaic_0001>

<bundles_post_ra>
// kernel: tpu_custom_call.1
= control target key start
LH: loop header
LB: loop body
LE: loop exit
PB: predicated region body
PF: predicated region fallthrough
CT: control target
= control target key end

     0   :  { %9 = vsyncpa [#allocation4], 0  ;;  %s3870_s0 = inlined_call_operand.hbm [shape: bf16[64,128], index: 0, kind: input, shape index: {}]   ;;  %s3871_s1 = inlined_call_operand.hbm [shape: bf16[128,512], index: 1, kind: input, shape index: {}]   ;;  %s3872_s2 = inlined_call_operand.hbm [shape: f32[128,512], index: 2, kind: input, shape index: {}]   ;;  %s3873_s3 = inlined_call_operand.hbm [shape: f32[1,512], index: 3, kind: input, shape index: {}]   ;;  %s3874_s4 = inlined_call_operand.hbm [shape: f32[64,128], index: 4, kind: output, shape index: {}]  }
   0x1   :  { %10 = vsyncpa [#allocation7], 0 }
   0x2   :  { %11 = vsyncpa [#allocation10], 0  ;;  %s30_s17 = sshll.u32 %s3871_s1, 4  ;;  %s31_s17 = int_to_ptr.hbm [resolvable:$true] %s30_s17 }
   0x3   :  { %12 = vsyncpa [#allocation5], 0  ;;  %s2722_s18 = smov [#allocation6]   ;;  %s17_s22 = sshll.u32 %s3870_s0, 4  ;;  %s18_s22 = int_to_ptr.hbm [resolvable:$true] %s17_s22 }
   0x4   :  { %s32_s19 = sshll.u32 %s2722_s18, 4  ;;  %s2723_s23 = smov 256   ;;  %s33_s19 = int_to_ptr.vmem [resolvable:$true] %s32_s19 }
   0x5   :  { %s2724_s24 = smov 16   ;;  %s2725_s25 = smov [#allocation3]  }
   0x6   :  { %38 = dma.hbm_to_vmem [thread:$0]  %s31_s17, 4096, %s33_s19, [#allocation7], %s2723_s23, %s2723_s23, %s2724_s24  }
   0x7   :  { %s19_s26 = sshll.u32 %s2725_s25, 4  ;;  %s2726_s27 = smov 64   ;;  %s20_s26 = int_to_ptr.vmem [resolvable:$true] %s19_s26 }
   0x8   :  { %s2727_s28 = smov 4   ;;  %s43_s30 = sshll.u32 %s3872_s2, 4  ;;  %s44_s30 = int_to_ptr.hbm [resolvable:$true] %s43_s30 }
   0x9   :  { %25 = dma.hbm_to_vmem [thread:$0]  %s18_s22, 512, %s20_s26, [#allocation4], %s2726_s27, %s2726_s27, %s2727_s28  }
   0xa   :  { %s2728_s5 = smov [#allocation8]   ;;  %s57_s8 = sshll.u32 %s3873_s3, 4  ;;  %s58_s8 = int_to_ptr.hbm [resolvable:$true] %s57_s8 }
   0xb   :  { %s45_s6 = sshll.u32 %s2728_s5, 4  ;;  %s2729_s9 = smov 512   ;;  %s46_s6 = int_to_ptr.vmem [resolvable:$true] %s45_s6 }
   0xc   :  { %s2730_s10 = smov 32   ;;  %s2731_s11 = smov [#allocation9]  }
   0xd   :  { %51 = dma.hbm_to_vmem [thread:$0]  %s44_s30, 8192, %s46_s6, [#allocation7], %s2729_s9, %s2729_s9, %s2730_s10  }
   0xe   :  { %s59_s12 = sshll.u32 %s2731_s11, 4  ;;  %s60_s12 = int_to_ptr.vmem [resolvable:$true] %s59_s12 }
   0xf   :  { %62 = dma.hbm_to_vmem [thread:$0]  %s58_s8, 64, %s60_s12, [#allocation10]  }
  0x10   :  { %2714 = dma.done.wait [#allocation4], 512  }
  0x11   :  { %2715 = vsyncadd [#allocation4], 4294966784 }
  0x12   :  { %2716 = dma.done.wait [#allocation7], 12288  }
  0x13   :  { %2717 = vsyncadd [#allocation7], 4294955008 }
  0x14   :  { %2718 = dma.done.wait [#allocation10], 64  }
  0x15   :  { %2719 = vsyncadd [#allocation10], 4294967232  ;;  %v2378_v0 = vld [vmem:[#allocation6 + $0xe0] sm:$0xf]  ;;  %v2450_v1 = vld [vmem:[#allocation6 + $0xec] sm:$0xf0] }
  0x16   :  { %v2448_v2 = vld [vmem:[#allocation6 + $0xe4] sm:$0xf]  ;;  %v2379_v3 = vor.u32 %v2450_v1, %v2378_v0  ;;  %v2380_v4 = vld [vmem:[#allocation6 + $0xf0] sm:$0xf0]  ;;  %v2386_v5 = vld [vmem:[#allocation6 + $0xe8] sm:$0xf] }
  0x17   :  { %v2451_v6 = vld [vmem:[#allocation6 + $0xf4] sm:$0xf0]  ;;  %v2383_v7 = vor.u32 %v2448_v2, %v2380_v4  ;;  %v2449_v9 = vld [vmem:[#allocation6 + $0xec] sm:$0xf]  ;;  %v2388_v10 = vld [vmem:[#allocation6 + $0xf8] sm:$0xf0] }
  0x18   :  { %v2387_v8 = vor.u32 %v2451_v6, %v2386_v5  ;;  %v2362_v11 = vld [vmem:[#allocation6 + $0xc0] sm:$0xf]  ;;  %313 = vmatpush.bf16.msra.mxu0 %v2379_v3  ;;  %v2391_v12 = vor.u32 %v2449_v9, %v2388_v10  ;;  %v2446_v13 = vld [vmem:[#allocation6 + $0xcc] sm:$0xf0]  ;;  %v2444_v14 = vld [vmem:[#allocation6 + $0xc4] sm:$0xf] }
  0x19   :  { %v2364_v15 = vld [vmem:[#allocation6 + $0xd0] sm:$0xf0]  ;;  %342 = vmatpush.bf16.msra.mxu1 %v2383_v7  ;;  %v2363_v16 = vor.u32 %v2446_v13, %v2362_v11  ;;  %v2370_v18 = vld [vmem:[#allocation6 + $0xc8] sm:$0xf]  ;;  %v2447_v19 = vld [vmem:[#allocation6 + $0xd4] sm:$0xf0] }
  0x1a   :  { %371 = vmatpush.bf16.msra.mxu2 %v2387_v8  ;;  %v2367_v17 = vor.u32 %v2444_v14, %v2364_v15  ;;  %v2445_v20 = vld [vmem:[#allocation6 + $0xcc] sm:$0xf]  ;;  %400 = vmatpush.bf16.msra.mxu3 %v2391_v12  ;;  %v2371_v21 = vor.u32 %v2447_v19, %v2370_v18  ;;  %v2372_v22 = vld [vmem:[#allocation6 + $0xd8] sm:$0xf0]  ;;  %v2346_v23 = vld [vmem:[#allocation6 + $0xa0] sm:$0xf] }
  0x1b   :  { %v2442_v24 = vld [vmem:[#allocation6 + $0xac] sm:$0xf0]  ;;  %v2375_v25 = vor.u32 %v2445_v20, %v2372_v22  ;;  %v2440_v26 = vld [vmem:[#allocation6 + $0xa4] sm:$0xf]  ;;  %v2348_v27 = vld [vmem:[#allocation6 + $0xb0] sm:$0xf0] }
  0x1c   :  { %v2354_v28 = vld [vmem:[#allocation6 + $0xa8] sm:$0xf]  ;;  %314 = vmatpush.bf16.msra.mxu0 %v2363_v16  ;;  %v2347_v29 = vor.u32 %v2442_v24, %v2346_v23  ;;  %v2443_v30 = vld [vmem:[#allocation6 + $0xb4] sm:$0xf0]  ;;  %v2441_v31 = vld [vmem:[#allocation6 + $0xac] sm:$0xf]  ;;  %v2351_v33 = vor.u32 %v2440_v26, %v2348_v27 }
  0x1d   :  { %v2356_v32 = vld [vmem:[#allocation6 + $0xb8] sm:$0xf0]  ;;  %343 = vmatpush.bf16.msra.mxu1 %v2367_v17  ;;  %v2355_v34 = vor.u32 %v2443_v30, %v2354_v28  ;;  %v2330_v35 = vld [vmem:[#allocation6 + $0x80] sm:$0xf]  ;;  %v2438_v36 = vld [vmem:[#allocation6 + $0x8c] sm:$0xf0] }
  0x1e   :  { %372 = vmatpush.bf16.msra.mxu2 %v2371_v21  ;;  %v2436_v37 = vld [vmem:[#allocation6 + $0x84] sm:$0xf]  ;;  %401 = vmatpush.bf16.msra.mxu3 %v2375_v25  ;;  %v2359_v38 = vor.u32 %v2441_v31, %v2356_v32  ;;  %v2332_v39 = vld [vmem:[#allocation6 + $0x90] sm:$0xf0]  ;;  %v2338_v40 = vld [vmem:[#allocation6 + $0x88] sm:$0xf]  ;;  %v2331_v44 = vor.u32 %v2438_v36, %v2330_v35 }
  0x1f   :  { %v2439_v41 = vld [vmem:[#allocation6 + $0x94] sm:$0xf0]  ;;  %v2437_v42 = vld [vmem:[#allocation6 + $0x8c] sm:$0xf]  ;;  %v2340_v43 = vld [vmem:[#allocation6 + $0x98] sm:$0xf0]  ;;  %v2335_v45 = vor.u32 %v2436_v37, %v2332_v39 }
  0x20   :  { %315 = vmatpush.bf16.msra.mxu0 %v2347_v29  ;;  %v2339_v46 = vor.u32 %v2439_v41, %v2338_v40  ;;  %v2314_v47 = vld [vmem:[#allocation6 + $0x60] sm:$0xf]  ;;  %v2434_v48 = vld [vmem:[#allocation6 + $0x6c] sm:$0xf0]  ;;  %v2432_v49 = vld [vmem:[#allocation6 + $0x64] sm:$0xf]  ;;  %v2343_v50 = vor.u32 %v2437_v42, %v2340_v43 }
  0x21   :  { %344 = vmatpush.bf16.msra.mxu1 %v2351_v33  ;;  %v2316_v51 = vld [vmem:[#allocation6 + $0x70] sm:$0xf0]  ;;  %v2322_v52 = vld [vmem:[#allocation6 + $0x68] sm:$0xf]  ;;  %v2435_v53 = vld [vmem:[#allocation6 + $0x74] sm:$0xf0]  ;;  %v2315_v56 = vor.u32 %v2434_v48, %v2314_v47 }
  0x22   :  { %373 = vmatpush.bf16.msra.mxu2 %v2355_v34  ;;  %402 = vmatpush.bf16.msra.mxu3 %v2359_v38  ;;  %v2433_v54 = vld [vmem:[#allocation6 + $0x6c] sm:$0xf]  ;;  %v2324_v55 = vld [vmem:[#allocation6 + $0x78] sm:$0xf0]  ;;  %v2319_v57 = vor.u32 %v2432_v49, %v2316_v51  ;;  %v2323_v58 = vor.u32 %v2435_v53, %v2322_v52  ;;  %v2298_v59 = vld [vmem:[#allocation6 + $0x40] sm:$0xf] }
  0x23   :  { %v2430_v60 = vld [vmem:[#allocation6 + $0x4c] sm:$0xf0]  ;;  %v2428_v61 = vld [vmem:[#allocation6 + $0x44] sm:$0xf]  ;;  %v2327_v62 = vor.u32 %v2433_v54, %v2324_v55  ;;  %v2300_v63 = vld [vmem:[#allocation6 + $0x50] sm:$0xf0] }
  0x24   :  { %316 = vmatpush.bf16.msra.mxu0 %v2331_v44  ;;  %v2306_v0 = vld [vmem:[#allocation6 + $0x48] sm:$0xf]  ;;  %v2431_v1 = vld [vmem:[#allocation6 + $0x54] sm:$0xf0]  ;;  %v2429_v2 = vld [vmem:[#allocation6 + $0x4c] sm:$0xf]  ;;  %v2299_v4 = vor.u32 %v2430_v60, %v2298_v59  ;;  %v2303_v5 = vor.u32 %v2428_v61, %v2300_v63 }
  0x25   :  { %345 = vmatpush.bf16.msra.mxu1 %v2335_v45  ;;  %v2308_v3 = vld [vmem:[#allocation6 + $0x58] sm:$0xf0]  ;;  %v2307_v6 = vor.u32 %v2431_v1, %v2306_v0  ;;  %v2282_v7 = vld [vmem:[#allocation6 + $0x20] sm:$0xf]  ;;  %v2426_v8 = vld [vmem:[#allocation6 + $0x2c] sm:$0xf0] }
  0x26   :  { %374 = vmatpush.bf16.msra.mxu2 %v2339_v46  ;;  %403 = vmatpush.bf16.msra.mxu3 %v2343_v50  ;;  %v2424_v9 = vld [vmem:[#allocation6 + $0x24] sm:$0xf]  ;;  %v2311_v10 = vor.u32 %v2429_v2, %v2308_v3  ;;  %v2284_v11 = vld [vmem:[#allocation6 + $0x30] sm:$0xf0]  ;;  %v2290_v12 = vld [vmem:[#allocation6 + $0x28] sm:$0xf]  ;;  %v2283_v16 = vor.u32 %v2426_v8, %v2282_v7 }
  0x27   :  { %v2427_v13 = vld [vmem:[#allocation6 + $0x34] sm:$0xf0]  ;;  %v2425_v14 = vld [vmem:[#allocation6 + $0x2c] sm:$0xf]  ;;  %v2292_v15 = vld [vmem:[#allocation6 + $0x38] sm:$0xf0]  ;;  %v2287_v17 = vor.u32 %v2424_v9, %v2284_v11 }
  0x28   :  { %317 = vmatpush.bf16.msra.mxu0 %v2315_v56  ;;  %v2291_v18 = vor.u32 %v2427_v13, %v2290_v12  ;;  %v2266_v19 = vld [vmem:[#allocation6] sm:$0xf]  ;;  %v2422_v20 = vld [vmem:[#allocation6 + $0xc] sm:$0xf0]  ;;  %v2420_v21 = vld [vmem:[#allocation6 + $0x4] sm:$0xf]  ;;  %v2295_v22 = vor.u32 %v2425_v14, %v2292_v15 }
  0x29   :  { %346 = vmatpush.bf16.msra.mxu1 %v2319_v57  ;;  %v2268_v23 = vld [vmem:[#allocation6 + $0x10] sm:$0xf0]  ;;  %v2274_v24 = vld [vmem:[#allocation6 + $0x8] sm:$0xf]  ;;  %v2423_v25 = vld [vmem:[#allocation6 + $0x14] sm:$0xf0]  ;;  %v2267_v28 = vor.u32 %v2422_v20, %v2266_v19 }
  0x2a   :  { %375 = vmatpush.bf16.msra.mxu2 %v2323_v58  ;;  %404 = vmatpush.bf16.msra.mxu3 %v2327_v62  ;;  %v2421_v26 = vld [vmem:[#allocation6 + $0xc] sm:$0xf]  ;;  %v2276_v27 = vld [vmem:[#allocation6 + $0x18] sm:$0xf0]  ;;  %v2271_v29 = vor.u32 %v2420_v21, %v2268_v23  ;;  %v2275_v30 = vor.u32 %v2423_v25, %v2274_v24  ;;  %v2416_v32 = vld [vmem:[#allocation3] sm:$0xff]  ;;  %s2733_s2 = smov [#allocation11]  }
  0x2b   :  { %v2279_v31 = vor.u32 %v2421_v26, %v2276_v27  ;;  %v2773_v33 = vld [vmem:[#allocation8 + $0x1e0] sm:$0xff]  ;;  %v2775_v34 = vld [vmem:[#allocation8 + $0x1e8] sm:$0xff]  ;;  %v2783_v37 = vld [vmem:[#allocation8 + $0x1f8] sm:$0xff]  ;;  %s2224_s3 = sshll.u32 %s2733_s2, 4  ;;  %s2226_s15 = sshll.u32 %s3874_s4, 4  ;;  %s2225_s3 = int_to_ptr.vmem [resolvable:$true] %s2224_s3  ;;  %s2227_s15 = int_to_ptr.hbm [resolvable:$true] %s2226_s15 }
  0x2c   :  { %318 = vmatpush.bf16.msra.mxu0 %v2299_v4  ;;  %v2778_v35 = vld [vmem:[#allocation8 + $0x1c0] sm:$0xff]  ;;  %v2781_v36 = vld [vmem:[#allocation8 + $0x1c8] sm:$0xff]  ;;  %v2787_v39 = vld [vmem:[#allocation8 + $0x1f0] sm:$0xff]  ;;  %s2734_s16 = smov 128   ;;  %s2735_s17 = smov 8  }
  0x2d   :  { %347 = vmatpush.bf16.msra.mxu1 %v2303_v5  ;;  %v2785_v38 = vld [vmem:[#allocation8 + $0x1a0] sm:$0xff]  ;;  %v2790_v40 = vld [vmem:[#allocation8 + $0x1a8] sm:$0xff]  ;;  %v2792_v41 = vld [vmem:[#allocation8 + $0x1d8] sm:$0xff] }
  0x2e   :  { %376 = vmatpush.bf16.msra.mxu2 %v2307_v6  ;;  %405 = vmatpush.bf16.msra.mxu3 %v2311_v10  ;;  %v2796_v42 = vld [vmem:[#allocation8 + $0x180] sm:$0xff]  ;;  %v2798_v43 = vld [vmem:[#allocation8 + $0x1d0] sm:$0xff]  ;;  %v2801_v44 = vld [vmem:[#allocation8 + $0x188] sm:$0xff] }
  0x2f   :  { %v2803_v45 = vld [vmem:[#allocation8 + $0x1b8] sm:$0xff]  ;;  %v2808_v46 = vld [vmem:[#allocation8 + $0x160] sm:$0xff]  ;;  %v2810_v47 = vld [vmem:[#allocation8 + $0x1b0] sm:$0xff] }
  0x30   :  { %319 = vmatpush.bf16.msra.mxu0 %v2283_v16  ;;  %v2813_v48 = vld [vmem:[#allocation8 + $0x168] sm:$0xff]  ;;  %v2815_v49 = vld [vmem:[#allocation8 + $0x198] sm:$0xff]  ;;  %v2820_v50 = vld [vmem:[#allocation8 + $0x140] sm:$0xff] }
  0x31   :  { %348 = vmatpush.bf16.msra.mxu1 %v2287_v17  ;;  %v2822_v51 = vld [vmem:[#allocation8 + $0x190] sm:$0xff]  ;;  %v2825_v52 = vld [vmem:[#allocation8 + $0x148] sm:$0xff]  ;;  %v2827_v53 = vld [vmem:[#allocation8 + $0x178] sm:$0xff] }
  0x32   :  { %377 = vmatpush.bf16.msra.mxu2 %v2291_v18  ;;  %406 = vmatpush.bf16.msra.mxu3 %v2295_v22  ;;  %v2832_v54 = vld [vmem:[#allocation8 + $0x120] sm:$0xff]  ;;  %v2834_v55 = vld [vmem:[#allocation8 + $0x170] sm:$0xff]  ;;  %v2837_v56 = vld [vmem:[#allocation8 + $0x128] sm:$0xff] }
  0x33   :  { %v2839_v57 = vld [vmem:[#allocation8 + $0x158] sm:$0xff]  ;;  %v2844_v58 = vld [vmem:[#allocation8 + $0x100] sm:$0xff]  ;;  %v2846_v59 = vld [vmem:[#allocation8 + $0x150] sm:$0xff] }
  0x34   :  { %320 = vmatpush.bf16.msra.mxu0 %v2267_v28  ;;  %v2417_v60 = vld [vmem:[#allocation3 + $0x8] sm:$0xff]  ;;  %v2851_v62 = vld [vmem:[#allocation8 + $0x138] sm:$0xff]  ;;  %v2856_v63 = vld [vmem:[#allocation8 + $0x130] sm:$0xff] }
  0x35   :  { %349 = vmatpush.bf16.msra.mxu1 %v2271_v29  ;;  %v2849_v61 = vld [vmem:[#allocation8 + $0x108] sm:$0xff]  ;;  %v2862_v0 = vld [vmem:[#allocation8 + $0xe0] sm:$0xff]  ;;  %v2866_v2 = vld [vmem:[#allocation8 + $0x118] sm:$0xff] }
  0x36   :  { %378 = vmatpush.bf16.msra.mxu2 %v2275_v30  ;;  %407 = vmatpush.bf16.msra.mxu3 %v2279_v31  ;;  %v2864_v1 = vld [vmem:[#allocation8 + $0xe8] sm:$0xff]  ;;  %v2869_v3 = vld [vmem:[#allocation8 + $0xc0] sm:$0xff]  ;;  %v2871_v4 = vld [vmem:[#allocation8 + $0x110] sm:$0xff] }
  0x37   :  { %321 = vmatmul.bf16.vlgmr.msra.gmra.mxu0 %v2416_v32  ;;  %v2874_v5 = vld [vmem:[#allocation8 + $0xc8] sm:$0xff]  ;;  %v2876_v6 = vld [vmem:[#allocation8 + $0xf8] sm:$0xff]  ;;  %v2880_v7 = vld [vmem:[#allocation8 + $0xa0] sm:$0xff] }
  0x38   :  { %532 = vmatpush.msrb.mxu0 %v2773_v33  ;;  %350 = vmatmul.bf16.vlgmr.msra.gmra.mxu1 %v2416_v32  ;;  %v2882_v8 = vld [vmem:[#allocation8 + $0xf0] sm:$0xff]  ;;  %v2885_v9 = vld [vmem:[#allocation8 + $0xa8] sm:$0xff]  ;;  %v2887_v10 = vld [vmem:[#allocation8 + $0xd8] sm:$0xff] }
  0x39   :  { %552 = vmatpush.msrb.mxu1 %v2775_v34  ;;  %379 = vmatmul.bf16.vlgmr.msra.gmra.mxu2 %v2416_v32  ;;  %v2892_v11 = vld [vmem:[#allocation8 + $0x80] sm:$0xff]  ;;  %v2894_v12 = vld [vmem:[#allocation8 + $0xd0] sm:$0xff]  ;;  %v2897_v13 = vld [vmem:[#allocation8 + $0x88] sm:$0xff] }
  0x3a   :  { %408 = vmatmul.bf16.vlgmr.msra.gmra.mxu3 %v2416_v32  ;;  %533 = vmatpush.msrb.mxu0 %v2778_v35  ;;  %v2899_v14 = vld [vmem:[#allocation8 + $0xb8] sm:$0xff]  ;;  %v2904_v15 = vld [vmem:[#allocation8 + $0x60] sm:$0xff]  ;;  %v2906_v16 = vld [vmem:[#allocation8 + $0xb0] sm:$0xff] }
  0x3b   :  { %553 = vmatpush.msrb.mxu1 %v2781_v36  ;;  %592 = vmatpush.msrb.mxu3 %v2783_v37  ;;  %3911 = vst [vmem:[#allocation16_spill] sm:$0xff] %v2904_v15  ;;  %v2909_v17 = vld [vmem:[#allocation8 + $0x68] sm:$0xff]  ;;  %v2911_v18 = vld [vmem:[#allocation8 + $0x98] sm:$0xff]  ;;  %v2916_v19 = vld [vmem:[#allocation8 + $0x40] sm:$0xff] }
  0x3c   :  { %534 = vmatpush.msrb.mxu0 %v2785_v38  ;;  %572 = vmatpush.msrb.mxu2 %v2787_v39  ;;  %v2918_v20 = vld [vmem:[#allocation8 + $0x90] sm:$0xff]  ;;  %v2921_v21 = vld [vmem:[#allocation8 + $0x48] sm:$0xff]  ;;  %v2924_v22 = vld [vmem:[#allocation8 + $0x78] sm:$0xff] }
  0x3d   :  { %554 = vmatpush.msrb.mxu1 %v2790_v40  ;;  %593 = vmatpush.msrb.mxu3 %v2792_v41  ;;  %v2928_v23 = vld [vmem:[#allocation8 + $0x20] sm:$0xff]  ;;  %v2930_v24 = vld [vmem:[#allocation8 + $0x70] sm:$0xff]  ;;  %v2934_v26 = vld [vmem:[#allocation8 + $0x28] sm:$0xff] }
  0x3e   :  { %535 = vmatpush.msrb.mxu0 %v2796_v42  ;;  %573 = vmatpush.msrb.mxu2 %v2798_v43  ;;  %v2418_v25 = vld [vmem:[#allocation3 + $0x10] sm:$0xff]  ;;  %3912 = vst [vmem:[#allocation17_spill] sm:$0xff] %v2934_v26  ;;  %v2936_v27 = vld [vmem:[#allocation8 + $0x58] sm:$0xff]  ;;  %v2946_v29 = vld [vmem:[#allocation8] sm:$0xff] }
  0x3f   :  { %555 = vmatpush.msrb.mxu1 %v2801_v44  ;;  %594 = vmatpush.msrb.mxu3 %v2803_v45  ;;  %v2940_v28 = vld [vmem:[#allocation8 + $0x50] sm:$0xff]  ;;  %v2949_v30 = vld [vmem:[#allocation8 + $0x8] sm:$0xff]  ;;  %v2953_v32 = vld [vmem:[#allocation8 + $0x38] sm:$0xff] }
  0x40   :  { %536 = vmatpush.msrb.mxu0 %v2808_v46  ;;  %574 = vmatpush.msrb.mxu2 %v2810_v47  ;;  %v2951_v31 = vld [vmem:[#allocation8 + $0x30] sm:$0xff] }
  0x41   :  { %556 = vmatpush.msrb.mxu1 %v2813_v48  ;;  %595 = vmatpush.msrb.mxu3 %v2815_v49 }
  0x42   :  { %537 = vmatpush.msrb.mxu0 %v2820_v50  ;;  %575 = vmatpush.msrb.mxu2 %v2822_v51 }
  0x43   :  { %557 = vmatpush.msrb.mxu1 %v2825_v52  ;;  %596 = vmatpush.msrb.mxu3 %v2827_v53 }
  0x44   :  { %538 = vmatpush.msrb.mxu0 %v2832_v54  ;;  %576 = vmatpush.msrb.mxu2 %v2834_v55 }
  0x45   :  { %558 = vmatpush.msrb.mxu1 %v2837_v56  ;;  %597 = vmatpush.msrb.mxu3 %v2839_v57 }
  0x46   :  { %539 = vmatpush.msrb.mxu0 %v2844_v58  ;;  %577 = vmatpush.msrb.mxu2 %v2846_v59 }
  0x47   :  { %559 = vmatpush.msrb.mxu1 %v2849_v61  ;;  %598 = vmatpush.msrb.mxu3 %v2851_v62 }
  0x48   :  { %326 = vmatmul.bf16.gmra.mxu0 %v2417_v60  ;;  %578 = vmatpush.msrb.mxu2 %v2856_v63 }
  0x49   :  { %355 = vmatmul.bf16.gmra.mxu1 %v2417_v60  ;;  %384 = vmatmul.bf16.gmra.mxu2 %v2417_v60 }
  0x4a   :  { %413 = vmatmul.bf16.gmra.mxu3 %v2417_v60  ;;  %540 = vmatpush.msrb.mxu0 %v2862_v0  ;;  %v2956_v60 = vld [vmem:[#allocation8 + $0x10] sm:$0xff] }
  0x4b   :  { %560 = vmatpush.msrb.mxu1 %v2864_v1  ;;  %599 = vmatpush.msrb.mxu3 %v2866_v2 }
  0x4c   :  { %541 = vmatpush.msrb.mxu0 %v2869_v3  ;;  %579 = vmatpush.msrb.mxu2 %v2871_v4 }
  0x4d   :  { %561 = vmatpush.msrb.mxu1 %v2874_v5  ;;  %600 = vmatpush.msrb.mxu3 %v2876_v6 }
  0x4e   :  { %542 = vmatpush.msrb.mxu0 %v2880_v7  ;;  %580 = vmatpush.msrb.mxu2 %v2882_v8 }
  0x4f   :  { %562 = vmatpush.msrb.mxu1 %v2885_v9  ;;  %601 = vmatpush.msrb.mxu3 %v2887_v10 }
  0x50   :  { %543 = vmatpush.msrb.mxu0 %v2892_v11  ;;  %581 = vmatpush.msrb.mxu2 %v2894_v12 }
  0x51   :  { %563 = vmatpush.msrb.mxu1 %v2897_v13  ;;  %602 = vmatpush.msrb.mxu3 %v2899_v14 }
  0x52   :  { %544 = vmatpush.msrb.mxu0 %v2904_v15  ;;  %582 = vmatpush.msrb.mxu2 %v2906_v16 }
  0x53   :  { %564 = vmatpush.msrb.mxu1 %v2909_v17  ;;  %603 = vmatpush.msrb.mxu3 %v2911_v18 }
  0x54   :  { %545 = vmatpush.msrb.mxu0 %v2916_v19  ;;  %583 = vmatpush.msrb.mxu2 %v2918_v20 }
  0x55   :  { %565 = vmatpush.msrb.mxu1 %v2921_v21  ;;  %604 = vmatpush.msrb.mxu3 %v2924_v22 }
  0x56   :  { %546 = vmatpush.msrb.mxu0 %v2928_v23  ;;  %584 = vmatpush.msrb.mxu2 %v2930_v24 }
  0x57   :  { %566 = vmatpush.msrb.mxu1 %v2934_v26  ;;  %605 = vmatpush.msrb.mxu3 %v2936_v27  ;;  %v2960_v26 = vld [vmem:[#allocation8 + $0x18] sm:$0xff] }
  0x58   :  { %331 = vmatmul.bf16.gmra.mxu0 %v2418_v25  ;;  %585 = vmatpush.msrb.mxu2 %v2940_v28 }
  0x59   :  { %360 = vmatmul.bf16.gmra.mxu1 %v2418_v25  ;;  %389 = vmatmul.bf16.gmra.mxu2 %v2418_v25 }
  0x5a   :  { %418 = vmatmul.bf16.gmra.mxu3 %v2418_v25  ;;  %547 = vmatpush.msrb.mxu0 %v2946_v29  ;;  %v2419_v25 = vld [vmem:[#allocation3 + $0x18] sm:$0xff] }
  0x5b   :  { %567 = vmatpush.msrb.mxu1 %v2949_v30  ;;  %586 = vmatpush.msrb.mxu2 %v2951_v31 }
  0x5c   :  { %606 = vmatpush.msrb.mxu3 %v2953_v32  ;;  %751 = vmatpush.msra.mxu0 %v2773_v33 }
  0x5d   :  { %587 = vmatpush.msrb.mxu2 %v2956_v60  ;;  %771 = vmatpush.msra.mxu1 %v2775_v34 }
  0x5e   :  { %607 = vmatpush.msrb.mxu3 %v2960_v26  ;;  %752 = vmatpush.msra.mxu0 %v2778_v35 }
  0x5f   :  { %791 = vmatpush.msra.mxu2 %v2787_v39  ;;  %772 = vmatpush.msra.mxu1 %v2781_v36 }
  0x60   :  { %811 = vmatpush.msra.mxu3 %v2783_v37  ;;  %753 = vmatpush.msra.mxu0 %v2785_v38 }
  0x61   :  { %792 = vmatpush.msra.mxu2 %v2798_v43  ;;  %773 = vmatpush.msra.mxu1 %v2790_v40 }
  0x62   :  { %812 = vmatpush.msra.mxu3 %v2792_v41  ;;  %754 = vmatpush.msra.mxu0 %v2796_v42 }
  0x63   :  { %793 = vmatpush.msra.mxu2 %v2810_v47  ;;  %774 = vmatpush.msra.mxu1 %v2801_v44 }
  0x64   :  { %813 = vmatpush.msra.mxu3 %v2803_v45  ;;  %755 = vmatpush.msra.mxu0 %v2808_v46 }
  0x65   :  { %794 = vmatpush.msra.mxu2 %v2822_v51  ;;  %775 = vmatpush.msra.mxu1 %v2813_v48 }
  0x66   :  { %814 = vmatpush.msra.mxu3 %v2815_v49  ;;  %756 = vmatpush.msra.mxu0 %v2820_v50 }
  0x67   :  { %795 = vmatpush.msra.mxu2 %v2834_v55  ;;  %776 = vmatpush.msra.mxu1 %v2825_v52 }
  0x68   :  { %815 = vmatpush.msra.mxu3 %v2827_v53  ;;  %336 = vmatmul.bf16.gmra.mxu0 %v2419_v25 }
  0x69   :  { %365 = vmatmul.bf16.gmra.mxu1 %v2419_v25  ;;  %394 = vmatmul.bf16.gmra.mxu2 %v2419_v25 }
  0x6a   :  { %423 = vmatmul.bf16.gmra.mxu3 %v2419_v25  ;;  %796 = vmatpush.msra.mxu2 %v2846_v59  ;;  %v2732_v25 = vmov 0.0  }
  0x6b   :  { %816 = vmatpush.msra.mxu3 %v2839_v57  ;;  %757 = vmatpush.msra.mxu0 %v2832_v54 }
  0x6c   :  { %777 = vmatpush.msra.mxu1 %v2837_v56  ;;  %797 = vmatpush.msra.mxu2 %v2856_v63 }
  0x6d   :  { %817 = vmatpush.msra.mxu3 %v2851_v62  ;;  %758 = vmatpush.msra.mxu0 %v2844_v58 }
  0x6e   :  { %778 = vmatpush.msra.mxu1 %v2849_v61  ;;  %798 = vmatpush.msra.mxu2 %v2871_v4 }
  0x6f   :  { %818 = vmatpush.msra.mxu3 %v2866_v2  ;;  %759 = vmatpush.msra.mxu0 %v2862_v0 }
  0x70   :  { %779 = vmatpush.msra.mxu1 %v2864_v1  ;;  %799 = vmatpush.msra.mxu2 %v2882_v8 }
  0x71   :  { %819 = vmatpush.msra.mxu3 %v2876_v6  ;;  %760 = vmatpush.msra.mxu0 %v2869_v3 }
  0x72   :  { %780 = vmatpush.msra.mxu1 %v2874_v5  ;;  %800 = vmatpush.msra.mxu2 %v2894_v12 }
  0x73   :  { %820 = vmatpush.msra.mxu3 %v2887_v10  ;;  %761 = vmatpush.msra.mxu0 %v2880_v7 }
  0x74   :  { %781 = vmatpush.msra.mxu1 %v2885_v9  ;;  %801 = vmatpush.msra.mxu2 %v2906_v16 }
  0x75   :  { %821 = vmatpush.msra.mxu3 %v2899_v14  ;;  %762 = vmatpush.msra.mxu0 %v2892_v11 }
  0x76   :  { %782 = vmatpush.msra.mxu1 %v2897_v13  ;;  %802 = vmatpush.msra.mxu2 %v2918_v20 }
  0x77   :  { %822 = vmatpush.msra.mxu3 %v2911_v18  ;;  %763 = vmatpush.msra.mxu0 %v2904_v15  ;;  %v3913_v15 = vld [vmem:[#allocation17_spill] sm:$0xff] }
  0x78   :  { %548 = vmatmul.f32.vlgmr.msrb.gmra.mxu0 %v2732_v25  ;;  %783 = vmatpush.msra.mxu1 %v2909_v17 }
  0x79   :  { %568 = vmatmul.f32.vlgmr.msrb.gmra.mxu1 %v2732_v25  ;;  %588 = vmatmul.f32.vlgmr.msrb.gmra.mxu2 %v2732_v25 }
  0x7a   :  { %608 = vmatmul.f32.vlgmr.msrb.gmra.mxu3 %v2732_v25  ;;  %803 = vmatpush.msra.mxu2 %v2930_v24 }
  0x7b   :  { %823 = vmatpush.msra.mxu3 %v2924_v22  ;;  %764 = vmatpush.msra.mxu0 %v2916_v19 }
  0x7c   :  { %784 = vmatpush.msra.mxu1 %v2921_v21  ;;  %804 = vmatpush.msra.mxu2 %v2940_v28 }
  0x7d   :  { %824 = vmatpush.msra.mxu3 %v2936_v27  ;;  %765 = vmatpush.msra.mxu0 %v2928_v23 }
  0x7e   :  { %785 = vmatpush.msra.mxu1 %v3913_v15  ;;  %805 = vmatpush.msra.mxu2 %v2951_v31 }
  0x7f   :  { %825 = vmatpush.msra.mxu3 %v2953_v32  ;;  %766 = vmatpush.msra.mxu0 %v2946_v29 }
  0x80   :  { %786 = vmatpush.msra.mxu1 %v2949_v30  ;;  %806 = vmatpush.msra.mxu2 %v2956_v60 }
  0x81   :  { %826 = vmatpush.msra.mxu3 %v2960_v26  ;;  %971 = vmatpush.msrb.mxu0 %v2773_v33  ;;  %v3914_v33 = vld [vmem:[#allocation16_spill] sm:$0xff] }
  0x82   :  { %991 = vmatpush.msrb.mxu1 %v2775_v34  ;;  %1011 = vmatpush.msrb.mxu2 %v2787_v39 }
  0x83   :  { %1031 = vmatpush.msrb.mxu3 %v2783_v37  ;;  %972 = vmatpush.msrb.mxu0 %v2778_v35 }
  0x84   :  { %992 = vmatpush.msrb.mxu1 %v2781_v36  ;;  %1012 = vmatpush.msrb.mxu2 %v2798_v43  ;;  %v119_v36 = vld [vmem:[#allocation9] sm:$0xf] }
  0x85   :  { %1032 = vmatpush.msrb.mxu3 %v2792_v41  ;;  %973 = vmatpush.msrb.mxu0 %v2785_v38  ;;  %v121_v37 = vperm.slane %v119_v36, 0  ;;  %v122_v39 = vperm.slane %v119_v36, 1 }
  0x86   :  { %993 = vmatpush.msrb.mxu1 %v2790_v40  ;;  %1013 = vmatpush.msrb.mxu2 %v2810_v47 }
  0x87   :  { %1033 = vmatpush.msrb.mxu3 %v2803_v45  ;;  %974 = vmatpush.msrb.mxu0 %v2796_v42  ;;  %v3101_v45 = vperm.slane %v119_v36, 2 }
  0x88   :  { %994 = vmatpush.msrb.mxu1 %v2801_v44  ;;  %1014 = vmatpush.msrb.mxu2 %v2822_v51 }
  0x89   :  { %1034 = vmatpush.msrb.mxu3 %v2815_v49  ;;  %975 = vmatpush.msrb.mxu0 %v2808_v46  ;;  %v3103_v46 = vperm.slane %v119_v36, 3 }
  0x8a   :  { %995 = vmatpush.msrb.mxu1 %v2813_v48  ;;  %1015 = vmatpush.msrb.mxu2 %v2834_v55 }
  0x8b   :  { %1035 = vmatpush.msrb.mxu3 %v2827_v53  ;;  %976 = vmatpush.msrb.mxu0 %v2820_v50 }
  0x8c   :  { %996 = vmatpush.msrb.mxu1 %v2825_v52  ;;  %1016 = vmatpush.msrb.mxu2 %v2846_v59 }
  0x8d   :  { %1036 = vmatpush.msrb.mxu3 %v2839_v57  ;;  %977 = vmatpush.msrb.mxu0 %v2832_v54 }
  0x8e   :  { %997 = vmatpush.msrb.mxu1 %v2837_v56  ;;  %1017 = vmatpush.msrb.mxu2 %v2856_v63 }
  0x8f   :  { %1037 = vmatpush.msrb.mxu3 %v2851_v62  ;;  %978 = vmatpush.msrb.mxu0 %v2844_v58 }
  0x90   :  { %998 = vmatpush.msrb.mxu1 %v2849_v61  ;;  %1018 = vmatpush.msrb.mxu2 %v2871_v4 }
  0x91   :  { %1038 = vmatpush.msrb.mxu3 %v2866_v2  ;;  %979 = vmatpush.msrb.mxu0 %v2862_v0 }
  0x92   :  { %999 = vmatpush.msrb.mxu1 %v2864_v1  ;;  %1019 = vmatpush.msrb.mxu2 %v2882_v8 }
  0x93   :  { %1039 = vmatpush.msrb.mxu3 %v2876_v6  ;;  %980 = vmatpush.msrb.mxu0 %v2869_v3 }
  0x94   :  { %1000 = vmatpush.msrb.mxu1 %v2874_v5  ;;  %1020 = vmatpush.msrb.mxu2 %v2894_v12 }
  0x95   :  { %1040 = vmatpush.msrb.mxu3 %v2887_v10  ;;  %981 = vmatpush.msrb.mxu0 %v2880_v7 }
  0x96   :  { %1001 = vmatpush.msrb.mxu1 %v2885_v9  ;;  %1021 = vmatpush.msrb.mxu2 %v2906_v16 }
  0x97   :  { %1041 = vmatpush.msrb.mxu3 %v2899_v14  ;;  %982 = vmatpush.msrb.mxu0 %v2892_v11 }
  0x98   :  { %1002 = vmatpush.msrb.mxu1 %v2897_v13  ;;  %1022 = vmatpush.msrb.mxu2 %v2918_v20 }
  0x99   :  { %1042 = vmatpush.msrb.mxu3 %v2911_v18  ;;  %983 = vmatpush.msrb.mxu0 %v3914_v33 }
  0x9a   :  { %1003 = vmatpush.msrb.mxu1 %v2909_v17  ;;  %1023 = vmatpush.msrb.mxu2 %v2930_v24 }
  0x9b   :  { %1043 = vmatpush.msrb.mxu3 %v2924_v22  ;;  %984 = vmatpush.msrb.mxu0 %v2916_v19 }
  0x9c   :  { %1004 = vmatpush.msrb.mxu1 %v2921_v21  ;;  %1024 = vmatpush.msrb.mxu2 %v2940_v28 }
  0x9d   :  { %1044 = vmatpush.msrb.mxu3 %v2936_v27  ;;  %985 = vmatpush.msrb.mxu0 %v2928_v23 }
  0x9e   :  { %1005 = vmatpush.msrb.mxu1 %v3913_v15  ;;  %1025 = vmatpush.msrb.mxu2 %v2951_v31 }
  0x9f   :  { %1045 = vmatpush.msrb.mxu3 %v2953_v32  ;;  %986 = vmatpush.msrb.mxu0 %v2946_v29 }
  0xa0   :  { %1006 = vmatpush.msrb.mxu1 %v2949_v30  ;;  %1026 = vmatpush.msrb.mxu2 %v2956_v60 }
  0xa1   :  { %1046 = vmatpush.msrb.mxu3 %v2960_v26 }
  0xb4   :  { %v322_v34 = vpop.f32.mrf.mxu0 }
  0xb5   :  { %v351_v35 = vpop.f32.mrf.mxu1  ;;  %v323_v60 = vadd.f32 %v322_v34, %v121_v37 }
  0xb6   :  { %v352_v33 = vadd.f32 %v351_v35, %v122_v39 }
  0xbc   :  { %v3093_v38 = vpop.f32.mrf.mxu2  ;;  %v324_v41 = vpop.f32.mrf.mxu0 }
  0xbd   :  { %v3095_v40 = vpop.f32.mrf.mxu3  ;;  %v3097_v42 = vadd.f32 %v324_v41, %v121_v37  ;;  %v353_v43 = vpop.f32.mrf.mxu1 }
  0xbe   :  { %v3099_v44 = vadd.f32 %v353_v43, %v122_v39  ;;  %v410_v34 = vadd.f32 %v3095_v40, %v3103_v46 }
  0xc4   :  { %v382_v47 = vpop.f32.mrf.mxu2 }
  0xc5   :  { %v3106_v48 = vadd.f32 %v382_v47, %v3101_v45  ;;  %v411_v49 = vpop.f32.mrf.mxu3  ;;  %v327_v50 = vpop.f32.mrf.mxu0 }
  0xc6   :  { %v3109_v51 = vadd.f32 %v411_v49, %v3103_v46  ;;  %v3111_v52 = vadd.f32 %v327_v50, %v121_v37  ;;  %v356_v53 = vpop.f32.mrf.mxu1 }
  0xc7   :  { %v3113_v54 = vadd.f32 %v356_v53, %v122_v39 }
  0xcc   :  { %v385_v55 = vpop.f32.mrf.mxu2 }
  0xcd   :  { %v3116_v56 = vadd.f32 %v385_v55, %v3101_v45  ;;  %v414_v57 = vpop.f32.mrf.mxu3  ;;  %v329_v58 = vpop.f32.mrf.mxu0 }
  0xce   :  { %v3119_v59 = vadd.f32 %v414_v57, %v3103_v46  ;;  %v3121_v61 = vadd.f32 %v329_v58, %v121_v37  ;;  %v358_v62 = vpop.f32.mrf.mxu1 }
  0xcf   :  { %v3123_v63 = vadd.f32 %v358_v62, %v122_v39 }
  0xd0   :  { %3915 = vst [vmem:[#allocation17_spill] sm:$0xff] %v3121_v61  ;;  %v3359_v61 = vld [vmem:[#allocation8 + $0x30] sm:$0xff] }
  0xd1   :  { %3916 = vst [vmem:[#allocation16_spill] sm:$0xff] %v3123_v63  ;;  %v3355_v63 = vld [vmem:[#allocation8 + $0x28] sm:$0xff] }
  0xd4   :  { %v387_v0 = vpop.f32.mrf.mxu2 }
  0xd5   :  { %v3126_v1 = vadd.f32 %v387_v0, %v3101_v45  ;;  %v416_v2 = vpop.f32.mrf.mxu3  ;;  %v332_v3 = vpop.f32.mrf.mxu0 }
  0xd6   :  { %v3129_v4 = vadd.f32 %v416_v2, %v3103_v46  ;;  %v3131_v5 = vadd.f32 %v332_v3, %v121_v37  ;;  %v361_v6 = vpop.f32.mrf.mxu1 }
  0xd7   :  { %3917 = vst [vmem:[#allocation18_spill] sm:$0xff] %v3126_v1  ;;  %v3133_v7 = vadd.f32 %v361_v6, %v122_v39  ;;  %v381_v6 = vadd.f32 %v3093_v38, %v3101_v45 }
  0xd8   :  { %3918 = vst [vmem:[#allocation19_spill] sm:$0xff] %v3129_v4  ;;  %v3353_v4 = vld [vmem:[#allocation8 + $0x20] sm:$0xff] }
  0xd9   :  { %3919 = vst [vmem:[#allocation20_spill] sm:$0xff] %v3131_v5  ;;  %v3346_v5 = vld [vmem:[#allocation8 + $0x50] sm:$0xff] }
  0xda   :  { %3920 = vst [vmem:[#allocation21_spill] sm:$0xff] %v3133_v7  ;;  %v3344_v7 = vld [vmem:[#allocation8 + $0x48] sm:$0xff] }
  0xdb   :  { %3954 = vst [vmem:[#allocation55_spill] sm:$0xff] %v3344_v7 }
  0xdc   :  { %v390_v8 = vpop.f32.mrf.mxu2 }
  0xdd   :  { %v3136_v9 = vadd.f32 %v390_v8, %v3101_v45  ;;  %v419_v10 = vpop.f32.mrf.mxu3  ;;  %v334_v11 = vpop.f32.mrf.mxu0 }
  0xde   :  { %v3139_v12 = vadd.f32 %v419_v10, %v3103_v46  ;;  %v3141_v13 = vadd.f32 %v334_v11, %v121_v37  ;;  %v363_v14 = vpop.f32.mrf.mxu1 }
  0xdf   :  { %3921 = vst [vmem:[#allocation22_spill] sm:$0xff] %v3136_v9  ;;  %v3143_v15 = vadd.f32 %v363_v14, %v122_v39  ;;  %v3338_v9 = vld [vmem:[#allocation8 + $0x78] sm:$0xff] }
  0xe0   :  { %3922 = vst [vmem:[#allocation23_spill] sm:$0xff] %v3139_v12 }
  0xe1   :  { %3923 = vst [vmem:[#allocation24_spill] sm:$0xff] %v3141_v13  ;;  %v3336_v13 = vld [vmem:[#allocation8 + $0x70] sm:$0xff] }
  0xe2   :  { %3924 = vst [vmem:[#allocation25_spill] sm:$0xff] %v3143_v15  ;;  %v3332_v15 = vld [vmem:[#allocation8 + $0x68] sm:$0xff] }
  0xe3   :  { %3950 = vst [vmem:[#allocation51_spill] sm:$0xff] %v3332_v15 }
  0xe4   :  { %v392_v16 = vpop.f32.mrf.mxu2  ;;  %3951 = vst [vmem:[#allocation52_spill] sm:$0xff] %v3336_v13 }
  0xe5   :  { %v3146_v17 = vadd.f32 %v392_v16, %v3101_v45  ;;  %v421_v18 = vpop.f32.mrf.mxu3  ;;  %v337_v19 = vpop.f32.mrf.mxu0  ;;  %3952 = vst [vmem:[#allocation53_spill] sm:$0xff] %v3338_v9 }
  0xe6   :  { %v3149_v20 = vadd.f32 %v421_v18, %v3103_v46  ;;  %v3151_v21 = vadd.f32 %v337_v19, %v121_v37  ;;  %v366_v22 = vpop.f32.mrf.mxu1 }
  0xe7   :  { %3925 = vst [vmem:[#allocation26_spill] sm:$0xff] %v3146_v17  ;;  %v3153_v23 = vadd.f32 %v366_v22, %v122_v39 }
  0xe8   :  { %3926 = vst [vmem:[#allocation27_spill] sm:$0xff] %v3149_v20  ;;  %v3324_v20 = vld [vmem:[#allocation8 + $0x90] sm:$0xff] }
  0xe9   :  { %3927 = vst [vmem:[#allocation28_spill] sm:$0xff] %v3151_v21  ;;  %v3312_v21 = vld [vmem:[#allocation8 + $0xb0] sm:$0xff] }
  0xea   :  { %3928 = vst [vmem:[#allocation29_spill] sm:$0xff] %v3153_v23  ;;  %v3310_v23 = vld [vmem:[#allocation8 + $0xa8] sm:$0xff] }
  0xec   :  { %v395_v24 = vpop.f32.mrf.mxu2 }
  0xed   :  { %v3156_v26 = vadd.f32 %v395_v24, %v3101_v45  ;;  %v424_v27 = vpop.f32.mrf.mxu3  ;;  %v339_v28 = vpop.f32.mrf.mxu0 }
  0xee   :  { %v3159_v29 = vadd.f32 %v424_v27, %v3103_v46  ;;  %v3161_v30 = vadd.f32 %v339_v28, %v121_v37  ;;  %v368_v31 = vpop.f32.mrf.mxu1 }
  0xef   :  { %3929 = vst [vmem:[#allocation30_spill] sm:$0xff] %v3156_v26  ;;  %v3163_v32 = vadd.f32 %v368_v31, %v122_v39  ;;  %v3304_v26 = vld [vmem:[#allocation8 + $0xd8] sm:$0xff] }
  0xf0   :  { %3930 = vst [vmem:[#allocation31_spill] sm:$0xff] %v3159_v29  ;;  %v3308_v29 = vld [vmem:[#allocation8 + $0xa0] sm:$0xff] }
  0xf1   :  { %3931 = vst [vmem:[#allocation32_spill] sm:$0xff] %v3161_v30 }
  0xf2   :  { %3932 = vst [vmem:[#allocation33_spill] sm:$0xff] %v3163_v32 }
  0xf4   :  { %v397_v25 = vpop.f32.mrf.mxu2 }
  0xf5   :  { %v3166_v36 = vadd.f32 %v397_v25, %v3101_v45  ;;  %v426_v41 = vpop.f32.mrf.mxu3  ;;  %v549_v43 = vpop.f32.mrf.mxu0 }
  0xf6   :  { %v3169_v47 = vadd.f32 %v426_v41, %v3103_v46  ;;  %v612_v49 = vadd.f32 %v549_v43, %v323_v60  ;;  %v569_v50 = vpop.f32.mrf.mxu1 }
  0xf7   :  { %3933 = vst [vmem:[#allocation34_spill] sm:$0xff] %v3166_v36  ;;  %v613_v53 = vadd.f32 %v569_v50, %v352_v33  ;;  %v3296_v36 = vld [vmem:[#allocation8 + $0xc8] sm:$0xff] }
  0xf8   :  { %3934 = vst [vmem:[#allocation35_spill] sm:$0xff] %v3169_v47  ;;  %v2392_v55 = vmul.f32 -1.442695, %v612_v49  ;;  %v3298_v47 = vld [vmem:[#allocation8 + $0xd0] sm:$0xff] }
  0xf9   :  { %v2393_v57 = vmul.f32 -1.442695, %v613_v53 }
  0xfa   :  { %2466 = vpow2.f32 %v2392_v55 }
  0xfb   :  { %2468 = vpow2.f32 %v2393_v57 }
  0xfc   :  { %v589_v3 = vpop.f32.mrf.mxu2 }
  0xfd   :  { %v609_v37 = vpop.f32.mrf.mxu3  ;;  %v614_v11 = vadd.f32 %v589_v3, %v381_v6 }
  0xfe   :  { %v615_v35 = vadd.f32 %v609_v37, %v410_v34 }
 0x100   :  { %v2467_v39 = vpop.eup %2466  ;;  %v2394_v58 = vmul.f32 -1.442695, %v615_v35 }
 0x101   :  { %v2469_v62 = vpop.eup %2468  ;;  %v619_v0 = vadd.f32 1.0, %v2467_v39 }
 0x102   :  { %v638_v2 = vadd.f32 1.0, %v2469_v62  ;;  %2470 = vpow2.f32 %v2394_v58 }
 0x103   :  { %2472 = vrcp.f32 %v619_v0  ;;  %v631_v22 = vand.u32 2147483648, %v619_v0  ;;  %v629_v28 = vand.u32 2147483647, %v619_v0  ;;  %vm625_vm2 = vweird.f32 %v619_v0 }
 0x104   :  { %2474 = vrcp.f32 %v638_v2  ;;  %v650_v24 = vand.u32 2147483648, %v638_v2  ;;  %v648_v60 = vand.u32 2147483647, %v638_v2  ;;  %vm644_vm3 = vweird.f32 %v638_v2 }
 0x105   :  { %v632_v25 = vor.u32 1.1754944e-38, %v631_v22  ;;  %vm630_vm5 = vcmp.eq.f32.partialorder %v629_v28, 8.507059e+37 }
 0x106   :  { %v651_v41 = vor.u32 1.1754944e-38, %v650_v24  ;;  %vm649_vm7 = vcmp.eq.f32.partialorder %v648_v60, 8.507059e+37 }
 0x108   :  { %v2471_v8 = vpop.eup %2470 }
 0x109   :  { %v2473_v10 = vpop.eup %2472  ;;  %v658_v14 = vadd.f32 1.0, %v2471_v8 }
 0x10a   :  { %v2475_v16 = vpop.eup %2474  ;;  %v621_v40 = vmul.f32 %v2473_v10, %v619_v0  ;;  %vm626_vm0 = vweird.f32 %v2473_v10 }
 0x10b   :  { %v640_v46 = vmul.f32 %v2475_v16, %v638_v2  ;;  %2476 = vrcp.f32 %v658_v14  ;;  %vm645_vm1 = vweird.f32 %v2475_v16  ;;  %vm627_vm4 = vmor %vm625_vm2, %vm626_vm0  ;;  %v670_v0 = vand.u32 2147483648, %v658_v14 }
 0x10c   :  { %v622_v18 = vsub.f32 1.0, %v621_v40  ;;  %2478 = vtanh.f32 %v614_v11  ;;  %vm646_vm6 = vmor %vm644_vm3, %vm645_vm1  ;;  %vm664_vm9 = vweird.f32 %v658_v14  ;;  %v668_v2 = vand.u32 2147483647, %v658_v14 }
 0x10d   :  { %v641_v19 = vsub.f32 1.0, %v640_v46  ;;  %v671_v6 = vor.u32 1.1754944e-38, %v670_v0 }
 0x10e   :  { %v623_v27 = vmul.f32 %v2473_v10, %v622_v18  ;;  %vm669_vm11 = vcmp.eq.f32.partialorder %v668_v2, 8.507059e+37 }
 0x10f   :  { %v642_v31 = vmul.f32 %v2475_v16, %v641_v19 }
 0x110   :  { %v624_v38 = vadd.f32 %v2473_v10, %v623_v27 }
 0x111   :  { %v2477_v45 = vpop.eup %2476  ;;  %v643_v33 = vadd.f32 %v2475_v16, %v642_v31 }
 0x112   :  { %v628_v43 = vsel %vm627_vm4, %v2473_v10, %v624_v38  ;;  %v660_v49 = vmul.f32 %v2477_v45, %v658_v14  ;;  %v2479_v50 = vpop.eup %2478  ;;  %vm665_vm8 = vweird.f32 %v2477_v45 }
 0x113   :  { %v633_v53 = vsel %vm630_vm5, %v632_v25, %v628_v43  ;;  %v647_v55 = vsel %vm646_vm6, %v2475_v16, %v643_v33  ;;  %vm666_vm10 = vmor %vm664_vm9, %vm665_vm8 }
 0x114   :  { %v652_v57 = vsel %vm649_vm7, %v651_v41, %v647_v55  ;;  %v675_v34 = vmul.f32 %v2479_v50, %v633_v53  ;;  %v661_v37 = vsub.f32 1.0, %v660_v49 }
 0x115   :  { %v674_v35 = vmul.f32 0.0, %v652_v57 }
 0x116   :  { %v662_v39 = vmul.f32 %v2477_v45, %v661_v37 }
 0x117   :  { %v3175_v58 = vadd.f32 %v675_v34, %v674_v35 }
 0x118   :  { %v663_v62 = vadd.f32 %v2477_v45, %v662_v39 }
 0x119   :  { %2480 = vtanh.f32 %v3175_v58 }
 0x11a   :  { %v667_v3 = vsel %vm666_vm10, %v2477_v45, %v663_v62 }
 0x11b   :  { %v672_v10 = vsel %vm669_vm11, %v671_v6, %v667_v3 }
 0x11f   :  { %v2481_v8 = vpop.eup %2480 }
 0x120   :  { %v678_v11 = vmul.f32 %v2481_v8, %v672_v10 }
 0x122   :  { %679 = vst [vmem:[#allocation11] sm:$0xff] %v678_v11  ;;  %767 = vmatmul.f32.vlgmr.msra.gmra.mxu0 %v678_v11  ;;  %787 = vmatmul.f32.vlgmr.msra.gmra.mxu1 %v678_v11 }
 0x123   :  { %807 = vmatmul.f32.vlgmr.msra.gmra.mxu2 %v678_v11  ;;  %827 = vmatmul.f32.vlgmr.msra.gmra.mxu3 %v678_v11 }
 0x19f   :  { %v768_v16 = vpop.f32.mrf.mxu0  ;;  %v788_v40 = vpop.f32.mrf.mxu1 }
 0x1a0   :  { %v831_v46 = vadd.f32 %v768_v16, %v3097_v42  ;;  %v832_v18 = vadd.f32 %v788_v40, %v3099_v44 }
 0x1a2   :  { %v2395_v19 = vmul.f32 -1.442695, %v831_v46  ;;  %v2396_v14 = vmul.f32 -1.442695, %v832_v18 }
 0x1a4   :  { %2482 = vpow2.f32 %v2395_v19 }
 0x1a5   :  { %2484 = vpow2.f32 %v2396_v14 }
 0x1a6   :  { %v828_v22 = vpop.f32.mrf.mxu3  ;;  %v808_v45 = vpop.f32.mrf.mxu2 }
 0x1a7   :  { %v834_v24 = vadd.f32 %v828_v22, %v3109_v51  ;;  %v833_v44 = vadd.f32 %v808_v45, %v3106_v48 }
 0x1a9   :  { %v2397_v27 = vmul.f32 -1.442695, %v834_v24 }
 0x1aa   :  { %v2483_v28 = vpop.eup %2482 }
 0x1ab   :  { %v2485_v31 = vpop.eup %2484  ;;  %v838_v60 = vadd.f32 1.0, %v2483_v28  ;;  %2486 = vpow2.f32 %v2397_v27 }
 0x1ac   :  { %v857_v38 = vadd.f32 1.0, %v2485_v31 }
 0x1ad   :  { %2488 = vrcp.f32 %v838_v60  ;;  %v850_v53 = vand.u32 2147483648, %v838_v60  ;;  %v848_v34 = vand.u32 2147483647, %v838_v60  ;;  %vm844_vm14 = vweird.f32 %v838_v60 }
 0x1ae   :  { %2490 = vrcp.f32 %v857_v38  ;;  %v869_v55 = vand.u32 2147483648, %v857_v38  ;;  %v867_v35 = vand.u32 2147483647, %v857_v38  ;;  %vm863_vm15 = vweird.f32 %v857_v38 }
 0x1af   :  { %v851_v48 = vor.u32 1.1754944e-38, %v850_v53  ;;  %vm849_vm2 = vcmp.eq.f32.partialorder %v848_v34, 8.507059e+37  ;;  %v3214_v53 = vld [vmem:[#allocation8 + $0x1b0] sm:$0xff]  ;;  %v3224_v34 = vld [vmem:[#allocation8 + $0x188] sm:$0xff] }
 0x1b0   :  { %v870_v3 = vor.u32 1.1754944e-38, %v869_v55  ;;  %vm868_vm3 = vcmp.eq.f32.partialorder %v867_v35, 8.507059e+37  ;;  %v3218_v55 = vld [vmem:[#allocation8 + $0x1b8] sm:$0xff]  ;;  %3941 = vst [vmem:[#allocation42_spill] sm:$0xff] %v3224_v34 }
 0x1b1   :  { %v2487_v25 = vpop.eup %2486  ;;  %3939 = vst [vmem:[#allocation40_spill] sm:$0xff] %v3218_v55  ;;  %v3230_v35 = vld [vmem:[#allocation8 + $0x198] sm:$0xff] }
 0x1b2   :  { %v877_v42 = vadd.f32 1.0, %v2487_v25  ;;  %v3188_v25 = vld [vmem:[#allocation8 + $0x1e8] sm:$0xff] }
 0x1b3   :  { %v2489_v33 = vpop.eup %2488  ;;  %3935 = vst [vmem:[#allocation36_spill] sm:$0xff] %v3188_v25  ;;  %1211 = vmatpush.msra.mxu1 %v3188_v25 }
 0x1b4   :  { %v2491_v41 = vpop.eup %2490  ;;  %v840_v43 = vmul.f32 %v2489_v33, %v838_v60  ;;  %2492 = vrcp.f32 %v877_v42  ;;  %vm845_vm12 = vweird.f32 %v2489_v33  ;;  %v889_v24 = vand.u32 2147483648, %v877_v42 }
 0x1b5   :  { %v859_v49 = vmul.f32 %v2491_v41, %v857_v38  ;;  %2494 = vtanh.f32 %v833_v44  ;;  %vm864_vm13 = vweird.f32 %v2491_v41  ;;  %vm846_vm0 = vmor %vm844_vm14, %vm845_vm12  ;;  %vm883_vm5 = vweird.f32 %v877_v42  ;;  %v3198_v44 = vld [vmem:[#allocation8 + $0x1c0] sm:$0xff] }
 0x1b6   :  { %v841_v50 = vsub.f32 1.0, %v840_v43  ;;  %vm865_vm1 = vmor %vm863_vm15, %vm864_vm13  ;;  %v887_v27 = vand.u32 2147483647, %v877_v42  ;;  %v890_v31 = vor.u32 1.1754944e-38, %v889_v24  ;;  %3937 = vst [vmem:[#allocation38_spill] sm:$0xff] %v3198_v44  ;;  %v3202_v43 = vld [vmem:[#allocation8 + $0x1d0] sm:$0xff] }
 0x1b7   :  { %v860_v51 = vsub.f32 1.0, %v859_v49  ;;  %v3206_v49 = vld [vmem:[#allocation8 + $0x1d8] sm:$0xff]  ;;  %v3282_v24 = vld [vmem:[#allocation8 + $0xe0] sm:$0xff] }
 0x1b8   :  { %v842_v57 = vmul.f32 %v2489_v33, %v841_v50  ;;  %vm888_vm7 = vcmp.eq.f32.partialorder %v887_v27, 8.507059e+37  ;;  %v3210_v50 = vld [vmem:[#allocation8 + $0x1a0] sm:$0xff]  ;;  %v3284_v27 = vld [vmem:[#allocation8 + $0xe8] sm:$0xff] }
 0x1b9   :  { %v861_v37 = vmul.f32 %v2491_v41, %v860_v51  ;;  %v3212_v51 = vld [vmem:[#allocation8 + $0x1a8] sm:$0xff] }
 0x1ba   :  { %v2493_v39 = vpop.eup %2492  ;;  %v843_v62 = vadd.f32 %v2489_v33, %v842_v57  ;;  %v3222_v57 = vld [vmem:[#allocation8 + $0x180] sm:$0xff] }
 0x1bb   :  { %v862_v0 = vadd.f32 %v2491_v41, %v861_v37  ;;  %v879_v2 = vmul.f32 %v2493_v39, %v877_v42  ;;  %v2495_v8 = vpop.eup %2494  ;;  %vm884_vm4 = vweird.f32 %v2493_v39  ;;  %v3194_v42 = vld [vmem:[#allocation8 + $0x1f8] sm:$0xff]  ;;  %3940 = vst [vmem:[#allocation41_spill] sm:$0xff] %v3222_v57  ;;  %v3226_v37 = vld [vmem:[#allocation8 + $0x190] sm:$0xff] }
 0x1bc   :  { %v847_v6 = vsel %vm846_vm0, %v2489_v33, %v843_v62  ;;  %vm885_vm6 = vmor %vm883_vm5, %vm884_vm4  ;;  %v3190_v33 = vld [vmem:[#allocation8 + $0x1f0] sm:$0xff]  ;;  %1251 = vmatpush.msra.mxu3 %v3194_v42  ;;  %3942 = vst [vmem:[#allocation43_spill] sm:$0xff] %v3226_v37  ;;  %v3236_v62 = vld [vmem:[#allocation8 + $0x168] sm:$0xff] }
 0x1bd   :  { %v852_v10 = vsel %vm849_vm2, %v851_v48, %v847_v6  ;;  %v866_v11 = vsel %vm865_vm1, %v2491_v41, %v862_v0  ;;  %v880_v16 = vsub.f32 1.0, %v879_v2  ;;  %3936 = vst [vmem:[#allocation37_spill] sm:$0xff] %v3190_v33  ;;  %1231 = vmatpush.msra.mxu2 %v3190_v33  ;;  %v3200_v41 = vld [vmem:[#allocation8 + $0x1c8] sm:$0xff]  ;;  %v3238_v48 = vld [vmem:[#allocation8 + $0x170] sm:$0xff]  ;;  %v3242_v0 = vld [vmem:[#allocation8 + $0x178] sm:$0xff] }
 0x1be   :  { %v871_v40 = vsel %vm868_vm3, %v870_v3, %v866_v11  ;;  %v894_v46 = vmul.f32 %v2495_v8, %v852_v10  ;;  %3938 = vst [vmem:[#allocation39_spill] sm:$0xff] %v3200_v41  ;;  %1212 = vmatpush.msra.mxu1 %v3200_v41  ;;  %1252 = vmatpush.msra.mxu3 %v3206_v49  ;;  %v3246_v2 = vld [vmem:[#allocation8 + $0x140] sm:$0xff]  ;;  %v3248_v3 = vld [vmem:[#allocation8 + $0x148] sm:$0xff]  ;;  %v3250_v6 = vld [vmem:[#allocation8 + $0x150] sm:$0xff] }
 0x1bf   :  { %v893_v18 = vmul.f32 %v871_v40, %v3175_v58  ;;  %v881_v19 = vmul.f32 %v2493_v39, %v880_v16  ;;  %v3186_v58 = vld [vmem:[#allocation8 + $0x1e0] sm:$0xff]  ;;  %1232 = vmatpush.msra.mxu2 %v3202_v43  ;;  %3943 = vst [vmem:[#allocation44_spill] sm:$0xff] %v3242_v0  ;;  %v3254_v8 = vld [vmem:[#allocation8 + $0x158] sm:$0xff]  ;;  %v3260_v11 = vld [vmem:[#allocation8 + $0x128] sm:$0xff] }
 0x1c0   :  { %1191 = vmatpush.msra.mxu0 %v3186_v58  ;;  %1213 = vmatpush.msra.mxu1 %v3212_v51  ;;  %3944 = vst [vmem:[#allocation45_spill] sm:$0xff] %v3250_v6  ;;  %v3258_v10 = vld [vmem:[#allocation8 + $0x120] sm:$0xff]  ;;  %v3262_v16 = vld [vmem:[#allocation8 + $0x130] sm:$0xff]  ;;  %v3266_v40 = vld [vmem:[#allocation8 + $0x138] sm:$0xff] }
 0x1c1   :  { %v3183_v14 = vadd.f32 %v894_v46, %v893_v18  ;;  %v882_v22 = vadd.f32 %v2493_v39, %v881_v19  ;;  %1233 = vmatpush.msra.mxu2 %v3214_v53  ;;  %1253 = vmatpush.msra.mxu3 %v3218_v55  ;;  %3945 = vst [vmem:[#allocation46_spill] sm:$0xff] %v3260_v11  ;;  %v3270_v46 = vld [vmem:[#allocation8 + $0x100] sm:$0xff]  ;;  %v3272_v18 = vld [vmem:[#allocation8 + $0x108] sm:$0xff]  ;;  %v3274_v19 = vld [vmem:[#allocation8 + $0x110] sm:$0xff] }
 0x1c2   :  { %1192 = vmatpush.msra.mxu0 %v3198_v44  ;;  %1214 = vmatpush.msra.mxu1 %v3224_v34  ;;  %3946 = vst [vmem:[#allocation47_spill] sm:$0xff] %v3262_v16 }
 0x1c3   :  { %2496 = vtanh.f32 %v3183_v14  ;;  %v886_v28 = vsel %vm885_vm6, %v2493_v39, %v882_v22  ;;  %1234 = vmatpush.msra.mxu2 %v3226_v37  ;;  %1254 = vmatpush.msra.mxu3 %v3230_v35  ;;  %v3234_v39 = vld [vmem:[#allocation8 + $0x160] sm:$0xff]  ;;  %3947 = vst [vmem:[#allocation48_spill] sm:$0xff] %v3266_v40  ;;  %v3278_v22 = vld [vmem:[#allocation8 + $0x118] sm:$0xff] }
 0x1c4   :  { %v891_v38 = vsel %vm888_vm7, %v890_v31, %v886_v28  ;;  %1193 = vmatpush.msra.mxu0 %v3210_v50  ;;  %1215 = vmatpush.msra.mxu1 %v3236_v62  ;;  %v3286_v28 = vld [vmem:[#allocation8 + $0xf0] sm:$0xff]  ;;  %v3290_v31 = vld [vmem:[#allocation8 + $0xf8] sm:$0xff] }
 0x1c5   :  { %1235 = vmatpush.msra.mxu2 %v3238_v48  ;;  %1255 = vmatpush.msra.mxu3 %v3242_v0 }
 0x1c6   :  { %1194 = vmatpush.msra.mxu0 %v3222_v57  ;;  %1216 = vmatpush.msra.mxu1 %v3248_v3 }
 0x1c7   :  { %1236 = vmatpush.msra.mxu2 %v3250_v6  ;;  %1256 = vmatpush.msra.mxu3 %v3254_v8 }
 0x1c8   :  { %1195 = vmatpush.msra.mxu0 %v3234_v39  ;;  %1217 = vmatpush.msra.mxu1 %v3260_v11 }
 0x1c9   :  { %v2497_v60 = vpop.eup %2496  ;;  %1237 = vmatpush.msra.mxu2 %v3262_v16  ;;  %1257 = vmatpush.msra.mxu3 %v3266_v40 }
 0x1ca   :  { %v897_v45 = vmul.f32 %v2497_v60, %v891_v38  ;;  %1196 = vmatpush.msra.mxu0 %v3246_v2  ;;  %1218 = vmatpush.msra.mxu1 %v3272_v18 }
 0x1cb   :  { %1238 = vmatpush.msra.mxu2 %v3274_v19  ;;  %1258 = vmatpush.msra.mxu3 %v3278_v22 }
 0x1cc   :  { %899 = vst [vmem:[#allocation11 + $0x8] sm:$0xff] %v897_v45  ;;  %987 = vmatmul.f32.vlgmr.msrb.gmra.mxu0 %v897_v45  ;;  %1007 = vmatmul.f32.vlgmr.msrb.gmra.mxu1 %v897_v45 }
 0x1cd   :  { %1027 = vmatmul.f32.vlgmr.msrb.gmra.mxu2 %v897_v45  ;;  %1047 = vmatmul.f32.vlgmr.msrb.gmra.mxu3 %v897_v45  ;;  %v3294_v45 = vld [vmem:[#allocation8 + $0xc0] sm:$0xff] }
 0x1ce   :  { %1197 = vmatpush.msra.mxu0 %v3258_v10  ;;  %1219 = vmatpush.msra.mxu1 %v3284_v27 }
 0x1cf   :  { %1239 = vmatpush.msra.mxu2 %v3286_v28  ;;  %1259 = vmatpush.msra.mxu3 %v3290_v31 }
 0x1d0   :  { %1198 = vmatpush.msra.mxu0 %v3270_v46  ;;  %1220 = vmatpush.msra.mxu1 %v3296_v36 }
 0x1d1   :  { %1240 = vmatpush.msra.mxu2 %v3298_v47  ;;  %1260 = vmatpush.msra.mxu3 %v3304_v26 }
 0x1d2   :  { %1199 = vmatpush.msra.mxu0 %v3282_v24  ;;  %1221 = vmatpush.msra.mxu1 %v3310_v23 }
 0x1d3   :  { %1241 = vmatpush.msra.mxu2 %v3312_v21 }
 0x1d4   :  { %1200 = vmatpush.msra.mxu0 %v3294_v45 }
 0x1d5   :  { %1242 = vmatpush.msra.mxu2 %v3324_v20 }
 0x1d6   :  { %1201 = vmatpush.msra.mxu0 %v3308_v29 }
 0x1d7   :  { %1243 = vmatpush.msra.mxu2 %v3336_v13 }
 0x1d9   :  { %1244 = vmatpush.msra.mxu2 %v3346_v5 }
 0x1db   :  { %1245 = vmatpush.msra.mxu2 %v3359_v61 }
 0x249   :  { %v988_v60 = vpop.f32.mrf.mxu0  ;;  %v1008_v38 = vpop.f32.mrf.mxu1 }
 0x24a   :  { %v1051_v32 = vadd.f32 %v988_v60, %v3111_v52  ;;  %v1052_v30 = vadd.f32 %v1008_v38, %v3113_v54  ;;  %v3316_v54 = vld [vmem:[#allocation8 + $0xb8] sm:$0xff]  ;;  %v3320_v60 = vld [vmem:[#allocation8 + $0x80] sm:$0xff]  ;;  %v3322_v38 = vld [vmem:[#allocation8 + $0x88] sm:$0xff] }
 0x24b   :  { %1261 = vmatpush.msra.mxu3 %v3316_v54  ;;  %1202 = vmatpush.msra.mxu0 %v3320_v60 }
 0x24c   :  { %v2398_v17 = vmul.f32 -1.442695, %v1051_v32  ;;  %v2399_v52 = vmul.f32 -1.442695, %v1052_v30  ;;  %1222 = vmatpush.msra.mxu1 %v3322_v38  ;;  %v3328_v30 = vld [vmem:[#allocation8 + $0x98] sm:$0xff]  ;;  %v3330_v32 = vld [vmem:[#allocation8 + $0x60] sm:$0xff] }
 0x24d   :  { %3948 = vst [vmem:[#allocation49_spill] sm:$0xff] %v3328_v30  ;;  %1262 = vmatpush.msra.mxu3 %v3328_v30  ;;  %1203 = vmatpush.msra.mxu0 %v3330_v32 }
 0x24e   :  { %2498 = vpow2.f32 %v2398_v17  ;;  %3949 = vst [vmem:[#allocation50_spill] sm:$0xff] %v3330_v32  ;;  %v3340_v17 = vld [vmem:[#allocation8 + $0x40] sm:$0xff]  ;;  %1223 = vmatpush.msra.mxu1 %v3332_v15  ;;  %v3361_v15 = vld [vmem:[#allocation8 + $0x38] sm:$0xff] }
 0x24f   :  { %2500 = vpow2.f32 %v2399_v52  ;;  %3953 = vst [vmem:[#allocation54_spill] sm:$0xff] %v3340_v17  ;;  %v3348_v52 = vld [vmem:[#allocation8 + $0x58] sm:$0xff]  ;;  %1263 = vmatpush.msra.mxu3 %v3338_v9  ;;  %1204 = vmatpush.msra.mxu0 %v3340_v17  ;;  %v3371_v17 = vld [vmem:[#allocation8 + $0x10] sm:$0xff] }
 0x250   :  { %v1048_v12 = vpop.f32.mrf.mxu3  ;;  %1224 = vmatpush.msra.mxu1 %v3344_v7  ;;  %v3373_v7 = vld [vmem:[#allocation8 + $0x18] sm:$0xff]  ;;  %1246 = vmatpush.msra.mxu2 %v3371_v17 }
 0x251   :  { %v1054_v1 = vadd.f32 %v1048_v12, %v3119_v59  ;;  %1264 = vmatpush.msra.mxu3 %v3348_v52  ;;  %v3365_v59 = vld [vmem:[#allocation8] sm:$0xff]  ;;  %v3367_v12 = vld [vmem:[#allocation8 + $0x8] sm:$0xff]  ;;  %1205 = vmatpush.msra.mxu0 %v3353_v4 }
 0x252   :  { %1225 = vmatpush.msra.mxu1 %v3355_v63  ;;  %1451 = vmatpush.msrb.mxu2 %v3190_v33 }
 0x253   :  { %v2400_v32 = vmul.f32 -1.442695, %v1054_v1  ;;  %1265 = vmatpush.msra.mxu3 %v3361_v15  ;;  %1206 = vmatpush.msra.mxu0 %v3365_v59 }
 0x254   :  { %v2499_v9 = vpop.eup %2498  ;;  %1226 = vmatpush.msra.mxu1 %v3367_v12  ;;  %1452 = vmatpush.msrb.mxu2 %v3202_v43 }
 0x255   :  { %v2501_v13 = vpop.eup %2500  ;;  %v3375_v30 = vadd.f32 1.0, %v2499_v9  ;;  %2502 = vpow2.f32 %v2400_v32  ;;  %1266 = vmatpush.msra.mxu3 %v3373_v7  ;;  %1411 = vmatpush.msrb.mxu0 %v3186_v58  ;;  %v1028_v9 = vpop.f32.mrf.mxu2 }
 0x256   :  { %v3379_v1 = vadd.f32 1.0, %v2501_v13  ;;  %1431 = vmatpush.msrb.mxu1 %v3188_v25  ;;  %v1053_v33 = vadd.f32 %v1028_v9, %v3116_v56  ;;  %1453 = vmatpush.msrb.mxu2 %v3214_v53 }
 0x257   :  { %2504 = vrcp.f32 %v3375_v30  ;;  %1471 = vmatpush.msrb.mxu3 %v3194_v42  ;;  %1412 = vmatpush.msrb.mxu0 %v3198_v44  ;;  %vm1064_vm10 = vweird.f32 %v3375_v30 }
 0x258   :  { %2506 = vrcp.f32 %v3379_v1  ;;  %1432 = vmatpush.msrb.mxu1 %v3200_v41  ;;  %1454 = vmatpush.msrb.mxu2 %v3226_v37  ;;  %v1068_v37 = vand.u32 2147483647, %v3375_v30  ;;  %vm1083_vm11 = vweird.f32 %v3379_v1 }
 0x259   :  { %1472 = vmatpush.msrb.mxu3 %v3206_v49  ;;  %1413 = vmatpush.msrb.mxu0 %v3210_v50 }
 0x25a   :  { %1433 = vmatpush.msrb.mxu1 %v3212_v51  ;;  %1455 = vmatpush.msrb.mxu2 %v3238_v48  ;;  %vm1069_vm14 = vcmp.eq.f32.partialorder %v1068_v37, 8.507059e+37 }
 0x25b   :  { %v2503_v13 = vpop.eup %2502  ;;  %1473 = vmatpush.msrb.mxu3 %v3218_v55  ;;  %1414 = vmatpush.msrb.mxu0 %v3222_v57  ;;  %v1070_v55 = vand.u32 2147483648, %v3375_v30 }
 0x25c   :  { %v3395_v32 = vadd.f32 1.0, %v2503_v13  ;;  %1434 = vmatpush.msrb.mxu1 %v3224_v34  ;;  %v1089_v34 = vand.u32 2147483648, %v3379_v1  ;;  %1456 = vmatpush.msrb.mxu2 %v3250_v6 }
 0x25d   :  { %v2505_v25 = vpop.eup %2504  ;;  %1474 = vmatpush.msrb.mxu3 %v3230_v35  ;;  %1415 = vmatpush.msrb.mxu0 %v3234_v39 }
 0x25e   :  { %v2507_v44 = vpop.eup %2506  ;;  %v1060_v41 = vmul.f32 %v2505_v25, %v3375_v30  ;;  %2508 = vrcp.f32 %v3395_v32  ;;  %1435 = vmatpush.msrb.mxu1 %v3236_v62  ;;  %vm1065_vm8 = vweird.f32 %v2505_v25  ;;  %1457 = vmatpush.msrb.mxu2 %v3262_v16  ;;  %v1109_v37 = vand.u32 2147483648, %v3395_v32 }
 0x25f   :  { %v1079_v13 = vmul.f32 %v2507_v44, %v3379_v1  ;;  %2510 = vtanh.f32 %v1053_v33  ;;  %1475 = vmatpush.msrb.mxu3 %v3242_v0  ;;  %1416 = vmatpush.msrb.mxu0 %v3246_v2  ;;  %vm1084_vm9 = vweird.f32 %v2507_v44  ;;  %vm1066_vm12 = vmor %vm1064_vm10, %vm1065_vm8  ;;  %vm1103_vm1 = vweird.f32 %v3395_v32 }
 0x260   :  { %v1061_v56 = vsub.f32 1.0, %v1060_v41  ;;  %1436 = vmatpush.msrb.mxu1 %v3248_v3  ;;  %vm1085_vm13 = vmor %vm1083_vm11, %vm1084_vm9  ;;  %1458 = vmatpush.msrb.mxu2 %v3274_v19 }
 0x261   :  { %v1080_v9 = vsub.f32 1.0, %v1079_v13  ;;  %v1087_v13 = vand.u32 2147483647, %v3379_v1  ;;  %1476 = vmatpush.msrb.mxu3 %v3254_v8  ;;  %1417 = vmatpush.msrb.mxu0 %v3258_v10 }
 0x262   :  { %v1062_v57 = vmul.f32 %v2505_v25, %v1061_v56  ;;  %1437 = vmatpush.msrb.mxu1 %v3260_v11  ;;  %v1071_v56 = vor.u32 1.1754944e-38, %v1070_v55  ;;  %1459 = vmatpush.msrb.mxu2 %v3286_v28 }
 0x263   :  { %v1081_v41 = vmul.f32 %v2507_v44, %v1080_v9  ;;  %1477 = vmatpush.msrb.mxu3 %v3266_v40  ;;  %1418 = vmatpush.msrb.mxu0 %v3270_v46  ;;  %vm1088_vm15 = vcmp.eq.f32.partialorder %v1087_v13, 8.507059e+37  ;;  %v1110_v13 = vor.u32 1.1754944e-38, %v1109_v37  ;;  %v3968_v37 = vld [vmem:[#allocation42_spill] sm:$0xff] }
 0x264   :  { %v3421_v33 = vpop.eup %2508  ;;  %v1063_v0 = vadd.f32 %v2505_v25, %v1062_v57  ;;  %v1090_v57 = vor.u32 1.1754944e-38, %v1089_v34  ;;  %1438 = vmatpush.msrb.mxu1 %v3272_v18  ;;  %1460 = vmatpush.msrb.mxu2 %v3298_v47 }
 0x265   :  { %v1082_v9 = vadd.f32 %v2507_v44, %v1081_v41  ;;  %v1099_v6 = vmul.f32 %v3421_v33, %v3395_v32  ;;  %v2511_v1 = vpop.eup %2510  ;;  %1478 = vmatpush.msrb.mxu3 %v3278_v22  ;;  %1419 = vmatpush.msrb.mxu0 %v3282_v24  ;;  %vm1104_vm0 = vweird.f32 %v3421_v33 }
 0x266   :  { %v1067_v30 = vsel %vm1066_vm12, %v2505_v25, %v1063_v0  ;;  %1439 = vmatpush.msrb.mxu1 %v3284_v27  ;;  %1461 = vmatpush.msrb.mxu2 %v3312_v21  ;;  %v1107_v0 = vand.u32 2147483647, %v3395_v32  ;;  %vm1105_vm2 = vmor %vm1103_vm1, %vm1104_vm0  ;;  %v3960_v32 = vld [vmem:[#allocation54_spill] sm:$0xff] }
 0x267   :  { %v1072_v11 = vsel %vm1069_vm14, %v1071_v56, %v1067_v30  ;;  %v1086_v55 = vsel %vm1085_vm13, %v2507_v44, %v1082_v9  ;;  %v1100_v41 = vsub.f32 1.0, %v1099_v6  ;;  %1479 = vmatpush.msrb.mxu3 %v3290_v31  ;;  %1420 = vmatpush.msrb.mxu0 %v3294_v45  ;;  %v3955_v6 = vld [vmem:[#allocation49_spill] sm:$0xff]  ;;  %v3958_v56 = vld [vmem:[#allocation52_spill] sm:$0xff] }
 0x268   :  { %v1091_v16 = vsel %vm1088_vm15, %v1090_v57, %v1086_v55  ;;  %v1114_v40 = vmul.f32 %v2511_v1, %v1072_v11  ;;  %1440 = vmatpush.msrb.mxu1 %v3296_v36  ;;  %1462 = vmatpush.msrb.mxu2 %v3324_v20  ;;  %v3959_v9 = vld [vmem:[#allocation53_spill] sm:$0xff]  ;;  %vm1108_vm3 = vcmp.eq.f32.partialorder %v1107_v0, 8.507059e+37  ;;  %v3961_v57 = vld [vmem:[#allocation55_spill] sm:$0xff]  ;;  %v3962_v55 = vld [vmem:[#allocation36_spill] sm:$0xff] }
 0x269   :  { %v1113_v25 = vmul.f32 %v1091_v16, %v3183_v14  ;;  %v1101_v34 = vmul.f32 %v3421_v33, %v1100_v41  ;;  %1480 = vmatpush.msrb.mxu3 %v3304_v26  ;;  %1421 = vmatpush.msrb.mxu0 %v3308_v29  ;;  %v3956_v16 = vld [vmem:[#allocation50_spill] sm:$0xff]  ;;  %v3963_v41 = vld [vmem:[#allocation37_spill] sm:$0xff] }
 0x26a   :  { %1441 = vmatpush.msrb.mxu1 %v3310_v23  ;;  %1463 = vmatpush.msrb.mxu2 %v3958_v56 }
 0x26b   :  { %v3445_v44 = vadd.f32 %v1114_v40, %v1113_v25  ;;  %v1102_v14 = vadd.f32 %v3421_v33, %v1101_v34  ;;  %1481 = vmatpush.msrb.mxu3 %v3316_v54  ;;  %1422 = vmatpush.msrb.mxu0 %v3320_v60  ;;  %v3957_v40 = vld [vmem:[#allocation51_spill] sm:$0xff]  ;;  %v3964_v25 = vld [vmem:[#allocation38_spill] sm:$0xff] }
 0x26c   :  { %1442 = vmatpush.msrb.mxu1 %v3322_v38  ;;  %1464 = vmatpush.msrb.mxu2 %v3346_v5  ;;  %v3965_v34 = vld [vmem:[#allocation39_spill] sm:$0xff] }
 0x26d   :  { %2512 = vtanh.f32 %v3445_v44  ;;  %1482 = vmatpush.msrb.mxu3 %v3955_v6  ;;  %v1106_v11 = vsel %vm1105_vm2, %v3421_v33, %v1102_v14  ;;  %1423 = vmatpush.msrb.mxu0 %v3956_v16  ;;  %v3967_v14 = vld [vmem:[#allocation41_spill] sm:$0xff] }
 0x26e   :  { %1443 = vmatpush.msrb.mxu1 %v3957_v40  ;;  %v1111_v1 = vsel %vm1108_vm3, %v1110_v13, %v1106_v11  ;;  %1465 = vmatpush.msrb.mxu2 %v3359_v61 }
 0x26f   :  { %1483 = vmatpush.msrb.mxu3 %v3959_v9  ;;  %1424 = vmatpush.msrb.mxu0 %v3960_v32 }
 0x270   :  { %1444 = vmatpush.msrb.mxu1 %v3961_v57  ;;  %1466 = vmatpush.msrb.mxu2 %v3371_v17 }
 0x271   :  { %1484 = vmatpush.msrb.mxu3 %v3348_v52  ;;  %1425 = vmatpush.msrb.mxu0 %v3353_v4 }
 0x272   :  { %1445 = vmatpush.msrb.mxu1 %v3355_v63 }
 0x273   :  { %v2513_v30 = vpop.eup %2512  ;;  %1485 = vmatpush.msrb.mxu3 %v3361_v15  ;;  %1426 = vmatpush.msrb.mxu0 %v3365_v59 }
 0x274   :  { %v1117_v33 = vmul.f32 %v2513_v30, %v1111_v1  ;;  %1446 = vmatpush.msrb.mxu1 %v3367_v12 }
 0x275   :  { %1486 = vmatpush.msrb.mxu3 %v3373_v7 }
 0x276   :  { %1119 = vst [vmem:[#allocation11 + $0x10] sm:$0xff] %v1117_v33  ;;  %1207 = vmatmul.f32.vlgmr.msra.gmra.mxu0 %v1117_v33  ;;  %1227 = vmatmul.f32.vlgmr.msra.gmra.mxu1 %v1117_v33 }
 0x277   :  { %1247 = vmatmul.f32.vlgmr.msra.gmra.mxu2 %v1117_v33  ;;  %1267 = vmatmul.f32.vlgmr.msra.gmra.mxu3 %v1117_v33 }
 0x278   :  { %1631 = vmatpush.msra.mxu0 %v3186_v58  ;;  %1651 = vmatpush.msra.mxu1 %v3962_v55  ;;  %v3966_v58 = vld [vmem:[#allocation40_spill] sm:$0xff] }
 0x279   :  { %1671 = vmatpush.msra.mxu2 %v3963_v41  ;;  %1691 = vmatpush.msra.mxu3 %v3194_v42  ;;  %v3969_v42 = vld [vmem:[#allocation43_spill] sm:$0xff] }
 0x27a   :  { %1632 = vmatpush.msra.mxu0 %v3964_v25  ;;  %1652 = vmatpush.msra.mxu1 %v3965_v34 }
 0x27b   :  { %1672 = vmatpush.msra.mxu2 %v3202_v43  ;;  %1692 = vmatpush.msra.mxu3 %v3206_v49  ;;  %v3970_v43 = vld [vmem:[#allocation44_spill] sm:$0xff]  ;;  %v3971_v49 = vld [vmem:[#allocation45_spill] sm:$0xff] }
 0x27c   :  { %1633 = vmatpush.msra.mxu0 %v3210_v50  ;;  %1653 = vmatpush.msra.mxu1 %v3212_v51  ;;  %v3972_v50 = vld [vmem:[#allocation46_spill] sm:$0xff]  ;;  %v3973_v51 = vld [vmem:[#allocation47_spill] sm:$0xff] }
 0x27d   :  { %1673 = vmatpush.msra.mxu2 %v3214_v53  ;;  %1693 = vmatpush.msra.mxu3 %v3966_v58  ;;  %v3974_v53 = vld [vmem:[#allocation48_spill] sm:$0xff] }
 0x27e   :  { %1634 = vmatpush.msra.mxu0 %v3967_v14  ;;  %1654 = vmatpush.msra.mxu1 %v3968_v37 }
 0x27f   :  { %1674 = vmatpush.msra.mxu2 %v3969_v42  ;;  %1694 = vmatpush.msra.mxu3 %v3230_v35 }
 0x280   :  { %1635 = vmatpush.msra.mxu0 %v3234_v39  ;;  %1655 = vmatpush.msra.mxu1 %v3236_v62 }
 0x281   :  { %1675 = vmatpush.msra.mxu2 %v3238_v48  ;;  %1695 = vmatpush.msra.mxu3 %v3970_v43  ;;  %v3979_v43 = vld [vmem:[#allocation20_spill] sm:$0xff] }
 0x282   :  { %1636 = vmatpush.msra.mxu0 %v3246_v2  ;;  %1656 = vmatpush.msra.mxu1 %v3248_v3 }
 0x283   :  { %1676 = vmatpush.msra.mxu2 %v3971_v49  ;;  %1696 = vmatpush.msra.mxu3 %v3254_v8 }
 0x284   :  { %1637 = vmatpush.msra.mxu0 %v3258_v10  ;;  %1657 = vmatpush.msra.mxu1 %v3972_v50  ;;  %v3978_v10 = vld [vmem:[#allocation18_spill] sm:$0xff]  ;;  %v3980_v50 = vld [vmem:[#allocation21_spill] sm:$0xff] }
 0x285   :  { %1677 = vmatpush.msra.mxu2 %v3973_v51  ;;  %1697 = vmatpush.msra.mxu3 %v3974_v53 }
 0x286   :  { %1638 = vmatpush.msra.mxu0 %v3270_v46  ;;  %1658 = vmatpush.msra.mxu1 %v3272_v18 }
 0x287   :  { %1678 = vmatpush.msra.mxu2 %v3274_v19  ;;  %1698 = vmatpush.msra.mxu3 %v3278_v22 }
 0x288   :  { %1639 = vmatpush.msra.mxu0 %v3282_v24  ;;  %1659 = vmatpush.msra.mxu1 %v3284_v27 }
 0x289   :  { %1679 = vmatpush.msra.mxu2 %v3286_v28  ;;  %1699 = vmatpush.msra.mxu3 %v3290_v31 }
 0x28a   :  { %1640 = vmatpush.msra.mxu0 %v3294_v45  ;;  %1660 = vmatpush.msra.mxu1 %v3296_v36 }
 0x28b   :  { %1680 = vmatpush.msra.mxu2 %v3298_v47  ;;  %1700 = vmatpush.msra.mxu3 %v3304_v26  ;;  %v3976_v26 = vld [vmem:[#allocation16_spill] sm:$0xff] }
 0x28c   :  { %1641 = vmatpush.msra.mxu0 %v3308_v29  ;;  %1661 = vmatpush.msra.mxu1 %v3310_v23 }
 0x28d   :  { %1681 = vmatpush.msra.mxu2 %v3312_v21  ;;  %1701 = vmatpush.msra.mxu3 %v3316_v54  ;;  %v3975_v21 = vld [vmem:[#allocation17_spill] sm:$0xff] }
 0x28e   :  { %1642 = vmatpush.msra.mxu0 %v3320_v60  ;;  %1662 = vmatpush.msra.mxu1 %v3322_v38 }
 0x28f   :  { %1682 = vmatpush.msra.mxu2 %v3324_v20  ;;  %1702 = vmatpush.msra.mxu3 %v3955_v6 }
 0x290   :  { %1643 = vmatpush.msra.mxu0 %v3956_v16  ;;  %1663 = vmatpush.msra.mxu1 %v3957_v40 }
 0x291   :  { %1683 = vmatpush.msra.mxu2 %v3958_v56  ;;  %1703 = vmatpush.msra.mxu3 %v3959_v9 }
 0x292   :  { %1644 = vmatpush.msra.mxu0 %v3960_v32  ;;  %1664 = vmatpush.msra.mxu1 %v3961_v57 }
 0x293   :  { %1684 = vmatpush.msra.mxu2 %v3346_v5  ;;  %1704 = vmatpush.msra.mxu3 %v3348_v52 }
 0x294   :  { %1645 = vmatpush.msra.mxu0 %v3353_v4  ;;  %1665 = vmatpush.msra.mxu1 %v3355_v63 }
 0x295   :  { %1685 = vmatpush.msra.mxu2 %v3359_v61  ;;  %1705 = vmatpush.msra.mxu3 %v3361_v15  ;;  %v3977_v15 = vld [vmem:[#allocation19_spill] sm:$0xff] }
 0x296   :  { %1646 = vmatpush.msra.mxu0 %v3365_v59  ;;  %1666 = vmatpush.msra.mxu1 %v3367_v12 }
 0x297   :  { %1686 = vmatpush.msra.mxu2 %v3371_v17  ;;  %1706 = vmatpush.msra.mxu3 %v3373_v7 }
 0x2f3   :  { %v1208_v20 = vpop.f32.mrf.mxu0  ;;  %v1228_v5 = vpop.f32.mrf.mxu1 }
 0x2f4   :  { %v1271_v23 = vadd.f32 %v1208_v20, %v3975_v21  ;;  %v1272_v4 = vadd.f32 %v1228_v5, %v3976_v26  ;;  %v3981_v21 = vld [vmem:[#allocation23_spill] sm:$0xff] }
 0x2f6   :  { %v2401_v29 = vmul.f32 -1.442695, %v1271_v23  ;;  %v2402_v63 = vmul.f32 -1.442695, %v1272_v4 }
 0x2f8   :  { %2514 = vpow2.f32 %v2401_v29 }
 0x2f9   :  { %2516 = vpow2.f32 %v2402_v63 }
 0x2fa   :  { %v1268_v61 = vpop.f32.mrf.mxu3  ;;  %v1248_v7 = vpop.f32.mrf.mxu2 }
 0x2fb   :  { %v1274_v36 = vadd.f32 %v1268_v61, %v3977_v15  ;;  %v1273_v46 = vadd.f32 %v1248_v7, %v3978_v10 }
 0x2fd   :  { %v2403_v47 = vmul.f32 -1.442695, %v1274_v36 }
 0x2fe   :  { %v2515_v35 = vpop.eup %2514 }
 0x2ff   :  { %v2517_v39 = vpop.eup %2516  ;;  %v1278_v62 = vadd.f32 1.0, %v2515_v35  ;;  %2518 = vpow2.f32 %v2403_v47 }
 0x300   :  { %v1297_v48 = vadd.f32 1.0, %v2517_v39  ;;  %v3982_v39 = vld [vmem:[#allocation22_spill] sm:$0xff] }
 0x301   :  { %2520 = vrcp.f32 %v1278_v62  ;;  %v1290_v28 = vand.u32 2147483648, %v1278_v62  ;;  %v1288_v54 = vand.u32 2147483647, %v1278_v62  ;;  %vm1284_vm6 = vweird.f32 %v1278_v62 }
 0x302   :  { %2522 = vrcp.f32 %v1297_v48  ;;  %v1309_v31 = vand.u32 2147483648, %v1297_v48  ;;  %v1307_v38 = vand.u32 2147483647, %v1297_v48  ;;  %vm1303_vm7 = vweird.f32 %v1297_v48 }
 0x303   :  { %v1291_v59 = vor.u32 1.1754944e-38, %v1290_v28  ;;  %vm1289_vm10 = vcmp.eq.f32.partialorder %v1288_v54, 8.507059e+37 }
 0x304   :  { %v1310_v6 = vor.u32 1.1754944e-38, %v1309_v31  ;;  %vm1308_vm11 = vcmp.eq.f32.partialorder %v1307_v38, 8.507059e+37 }
 0x305   :  { %v2519_v2 = vpop.eup %2518 }
 0x306   :  { %v1317_v3 = vadd.f32 1.0, %v2519_v2 }
 0x307   :  { %v2521_v8 = vpop.eup %2520 }
 0x308   :  { %v2523_v18 = vpop.eup %2522  ;;  %v1280_v19 = vmul.f32 %v2521_v8, %v1278_v62  ;;  %2524 = vrcp.f32 %v1317_v3  ;;  %vm1285_vm4 = vweird.f32 %v2521_v8  ;;  %v1329_v55 = vand.u32 2147483648, %v1317_v3 }
 0x309   :  { %v1299_v22 = vmul.f32 %v2523_v18, %v1297_v48  ;;  %2526 = vtanh.f32 %v1273_v46  ;;  %vm1304_vm5 = vweird.f32 %v2523_v18  ;;  %vm1286_vm8 = vmor %vm1284_vm6, %vm1285_vm4  ;;  %vm1323_vm13 = vweird.f32 %v1317_v3 }
 0x30a   :  { %v1281_v24 = vsub.f32 1.0, %v1280_v19  ;;  %vm1305_vm9 = vmor %vm1303_vm7, %vm1304_vm5  ;;  %v1327_v41 = vand.u32 2147483647, %v1317_v3  ;;  %v1330_v34 = vor.u32 1.1754944e-38, %v1329_v55 }
 0x30b   :  { %v1300_v27 = vsub.f32 1.0, %v1299_v22 }
 0x30c   :  { %v1282_v45 = vmul.f32 %v2521_v8, %v1281_v24  ;;  %vm1328_vm15 = vcmp.eq.f32.partialorder %v1327_v41, 8.507059e+37  ;;  %v3562_v41 = vld [vmem:[#allocation8 + $0x1e8] sm:$0xff] }
 0x30d   :  { %v1301_v60 = vmul.f32 %v2523_v18, %v1300_v27 }
 0x30e   :  { %v2525_v17 = vpop.eup %2524  ;;  %v1283_v52 = vadd.f32 %v2521_v8, %v1282_v45 }
 0x30f   :  { %v1302_v12 = vadd.f32 %v2523_v18, %v1301_v60  ;;  %v1319_v0 = vmul.f32 %v2525_v17, %v1317_v3  ;;  %v2527_v16 = vpop.eup %2526  ;;  %vm1324_vm12 = vweird.f32 %v2525_v17 }
 0x310   :  { %v1287_v11 = vsel %vm1286_vm8, %v2521_v8, %v1283_v52  ;;  %vm1325_vm14 = vmor %vm1323_vm13, %vm1324_vm12 }
 0x311   :  { %v1292_v40 = vsel %vm1289_vm10, %v1291_v59, %v1287_v11  ;;  %v1306_v13 = vsel %vm1305_vm9, %v2523_v18, %v1302_v12  ;;  %v1320_v56 = vsub.f32 1.0, %v1319_v0 }
 0x312   :  { %v1311_v9 = vsel %vm1308_vm11, %v1310_v6, %v1306_v13  ;;  %v1334_v32 = vmul.f32 %v2527_v16, %v1292_v40 }
 0x313   :  { %v1333_v57 = vmul.f32 %v1311_v9, %v3445_v44  ;;  %v1321_v30 = vmul.f32 %v2525_v17, %v1320_v56 }
 0x315   :  { %v3549_v1 = vadd.f32 %v1334_v32, %v1333_v57  ;;  %v1322_v33 = vadd.f32 %v2525_v17, %v1321_v30 }
 0x317   :  { %2528 = vtanh.f32 %v3549_v1  ;;  %v1326_v25 = vsel %vm1325_vm14, %v2525_v17, %v1322_v33 }
 0x318   :  { %v1331_v14 = vsel %vm1328_vm15, %v1330_v34, %v1326_v25  ;;  %v3564_v25 = vld [vmem:[#allocation8 + $0x1f0] sm:$0xff]  ;;  %v3568_v34 = vld [vmem:[#allocation8 + $0x1f8] sm:$0xff] }
 0x31d   :  { %v2529_v58 = vpop.eup %2528 }
 0x31e   :  { %v1337_v37 = vmul.f32 %v2529_v58, %v1331_v14  ;;  %v3572_v58 = vld [vmem:[#allocation8 + $0x1c0] sm:$0xff]  ;;  %v3574_v14 = vld [vmem:[#allocation8 + $0x1c8] sm:$0xff] }
 0x320   :  { %1339 = vst [vmem:[#allocation11 + $0x18] sm:$0xff] %v1337_v37  ;;  %1427 = vmatmul.f32.vlgmr.msrb.gmra.mxu0 %v1337_v37  ;;  %1447 = vmatmul.f32.vlgmr.msrb.gmra.mxu1 %v1337_v37 }
 0x321   :  { %1467 = vmatmul.f32.vlgmr.msrb.gmra.mxu2 %v1337_v37  ;;  %1487 = vmatmul.f32.vlgmr.msrb.gmra.mxu3 %v1337_v37  ;;  %v3576_v37 = vld [vmem:[#allocation8 + $0x1d0] sm:$0xff] }
 0x322   :  { %1871 = vmatpush.msrb.mxu1 %v3562_v41  ;;  %1891 = vmatpush.msrb.mxu2 %v3564_v25 }
 0x323   :  { %1911 = vmatpush.msrb.mxu3 %v3568_v34 }
 0x324   :  { %1872 = vmatpush.msrb.mxu1 %v3574_v14  ;;  %1892 = vmatpush.msrb.mxu2 %v3576_v37 }
 0x39d   :  { %v1428_v44 = vpop.f32.mrf.mxu0  ;;  %v1448_v42 = vpop.f32.mrf.mxu1 }
 0x39e   :  { %v1491_v49 = vadd.f32 %v1428_v44, %v3979_v43  ;;  %v1492_v51 = vadd.f32 %v1448_v42, %v3980_v50  ;;  %v3580_v44 = vld [vmem:[#allocation8 + $0x1d8] sm:$0xff]  ;;  %v3584_v42 = vld [vmem:[#allocation8 + $0x1a0] sm:$0xff]  ;;  %v3586_v43 = vld [vmem:[#allocation8 + $0x1a8] sm:$0xff] }
 0x39f   :  { %1912 = vmatpush.msrb.mxu3 %v3580_v44  ;;  %1873 = vmatpush.msrb.mxu1 %v3586_v43  ;;  %v3592_v50 = vld [vmem:[#allocation8 + $0x1b8] sm:$0xff] }
 0x3a0   :  { %v2404_v53 = vmul.f32 -1.442695, %v1491_v49  ;;  %v2405_v20 = vmul.f32 -1.442695, %v1492_v51  ;;  %v3588_v49 = vld [vmem:[#allocation8 + $0x1b0] sm:$0xff]  ;;  %v3596_v51 = vld [vmem:[#allocation8 + $0x180] sm:$0xff] }
 0x3a1   :  { %1893 = vmatpush.msrb.mxu2 %v3588_v49  ;;  %1913 = vmatpush.msrb.mxu3 %v3592_v50 }
 0x3a2   :  { %2530 = vpow2.f32 %v2404_v53  ;;  %v3598_v53 = vld [vmem:[#allocation8 + $0x188] sm:$0xff] }
 0x3a3   :  { %2532 = vpow2.f32 %v2405_v20  ;;  %v3600_v20 = vld [vmem:[#allocation8 + $0x190] sm:$0xff]  ;;  %1874 = vmatpush.msrb.mxu1 %v3598_v53 }
 0x3a4   :  { %v1488_v5 = vpop.f32.mrf.mxu3  ;;  %v1468_v15 = vpop.f32.mrf.mxu2  ;;  %1894 = vmatpush.msrb.mxu2 %v3600_v20 }
 0x3a5   :  { %v1494_v23 = vadd.f32 %v1488_v5, %v3981_v21  ;;  %v1493_v62 = vadd.f32 %v1468_v15, %v3982_v39  ;;  %v3604_v5 = vld [vmem:[#allocation8 + $0x198] sm:$0xff]  ;;  %v3608_v21 = vld [vmem:[#allocation8 + $0x160] sm:$0xff] }
 0x3a6   :  { %1914 = vmatpush.msrb.mxu3 %v3604_v5  ;;  %v3628_v15 = vld [vmem:[#allocation8 + $0x158] sm:$0xff] }
 0x3a7   :  { %v2406_v26 = vmul.f32 -1.442695, %v1494_v23  ;;  %v3610_v23 = vld [vmem:[#allocation8 + $0x168] sm:$0xff]  ;;  %v3640_v39 = vld [vmem:[#allocation8 + $0x138] sm:$0xff] }
 0x3a8   :  { %v2531_v4 = vpop.eup %2530  ;;  %1875 = vmatpush.msrb.mxu1 %v3610_v23 }
 0x3a9   :  { %v2533_v29 = vpop.eup %2532  ;;  %v1498_v63 = vadd.f32 1.0, %v2531_v4  ;;  %2534 = vpow2.f32 %v2406_v26  ;;  %v3612_v26 = vld [vmem:[#allocation8 + $0x170] sm:$0xff]  ;;  %v3616_v4 = vld [vmem:[#allocation8 + $0x178] sm:$0xff] }
 0x3aa   :  { %v1517_v61 = vadd.f32 1.0, %v2533_v29  ;;  %1895 = vmatpush.msrb.mxu2 %v3612_v26  ;;  %1915 = vmatpush.msrb.mxu3 %v3616_v4  ;;  %v3620_v29 = vld [vmem:[#allocation8 + $0x140] sm:$0xff] }
 0x3ab   :  { %2536 = vrcp.f32 %v1498_v63  ;;  %v1510_v10 = vand.u32 2147483648, %v1498_v63  ;;  %v1508_v19 = vand.u32 2147483647, %v1498_v63  ;;  %vm1504_vm2 = vweird.f32 %v1498_v63 }
 0x3ac   :  { %2538 = vrcp.f32 %v1517_v61  ;;  %v1529_v46 = vand.u32 2147483648, %v1517_v61  ;;  %v1527_v24 = vand.u32 2147483647, %v1517_v61  ;;  %vm1523_vm3 = vweird.f32 %v1517_v61  ;;  %1916 = vmatpush.msrb.mxu3 %v3628_v15 }
 0x3ad   :  { %v1511_v31 = vor.u32 1.1754944e-38, %v1510_v10  ;;  %vm1509_vm6 = vcmp.eq.f32.partialorder %v1508_v19, 8.507059e+37  ;;  %v3660_v10 = vld [vmem:[#allocation8 + $0xf0] sm:$0xff] }
 0x3ae   :  { %v1530_v60 = vor.u32 1.1754944e-38, %v1529_v46  ;;  %vm1528_vm7 = vcmp.eq.f32.partialorder %v1527_v24, 8.507059e+37  ;;  %1917 = vmatpush.msrb.mxu3 %v3640_v39  ;;  %v3664_v46 = vld [vmem:[#allocation8 + $0xf8] sm:$0xff]  ;;  %v3670_v24 = vld [vmem:[#allocation8 + $0xc8] sm:$0xff] }
 0x3af   :  { %v2535_v36 = vpop.eup %2534 }
 0x3b0   :  { %v1537_v47 = vadd.f32 1.0, %v2535_v36  ;;  %v3632_v36 = vld [vmem:[#allocation8 + $0x120] sm:$0xff] }
 0x3b1   :  { %v2537_v35 = vpop.eup %2536 }
 0x3b2   :  { %v2539_v48 = vpop.eup %2538  ;;  %v1500_v7 = vmul.f32 %v2537_v35, %v1498_v63  ;;  %2540 = vrcp.f32 %v1537_v47  ;;  %vm1505_vm0 = vweird.f32 %v2537_v35  ;;  %v1549_v56 = vand.u32 2147483648, %v1537_v47  ;;  %v3622_v63 = vld [vmem:[#allocation8 + $0x148] sm:$0xff] }
 0x3b3   :  { %v1519_v2 = vmul.f32 %v2539_v48, %v1517_v61  ;;  %2542 = vtanh.f32 %v1493_v62  ;;  %vm1524_vm1 = vweird.f32 %v2539_v48  ;;  %vm1506_vm4 = vmor %vm1504_vm2, %vm1505_vm0  ;;  %vm1543_vm9 = vweird.f32 %v1537_v47  ;;  %v3624_v61 = vld [vmem:[#allocation8 + $0x150] sm:$0xff]  ;;  %1876 = vmatpush.msrb.mxu1 %v3622_v63  ;;  %v3644_v62 = vld [vmem:[#allocation8 + $0x100] sm:$0xff] }
 0x3b4   :  { %v1501_v3 = vsub.f32 1.0, %v1500_v7  ;;  %vm1525_vm5 = vmor %vm1523_vm3, %vm1524_vm1  ;;  %v1547_v9 = vand.u32 2147483647, %v1537_v47  ;;  %v1550_v57 = vor.u32 1.1754944e-38, %v1549_v56  ;;  %1896 = vmatpush.msrb.mxu2 %v3624_v61  ;;  %v3648_v7 = vld [vmem:[#allocation8 + $0x110] sm:$0xff]  ;;  %v3704_v56 = vld [vmem:[#allocation8 + $0x60] sm:$0xff] }
 0x3b5   :  { %v1520_v8 = vsub.f32 1.0, %v1519_v2  ;;  %v3652_v2 = vld [vmem:[#allocation8 + $0x118] sm:$0xff]  ;;  %3985 = vst [vmem:[#allocation49_spill] sm:$0xff] %v3704_v56 }
 0x3b6   :  { %v1502_v18 = vmul.f32 %v2537_v35, %v1501_v3  ;;  %vm1548_vm11 = vcmp.eq.f32.partialorder %v1547_v9, 8.507059e+37  ;;  %1918 = vmatpush.msrb.mxu3 %v3652_v2  ;;  %v3656_v3 = vld [vmem:[#allocation8 + $0xe0] sm:$0xff]  ;;  %v3706_v9 = vld [vmem:[#allocation8 + $0x68] sm:$0xff] }
 0x3b7   :  { %v1521_v22 = vmul.f32 %v2539_v48, %v1520_v8  ;;  %v3658_v8 = vld [vmem:[#allocation8 + $0xe8] sm:$0xff]  ;;  %3986 = vst [vmem:[#allocation50_spill] sm:$0xff] %v3706_v9 }
 0x3b8   :  { %v2541_v27 = vpop.eup %2540  ;;  %v1503_v28 = vadd.f32 %v2537_v35, %v1502_v18  ;;  %1919 = vmatpush.msrb.mxu3 %v3664_v46 }
 0x3b9   :  { %v1522_v45 = vadd.f32 %v2539_v48, %v1521_v22  ;;  %v1539_v54 = vmul.f32 %v2541_v27, %v1537_v47  ;;  %v2543_v17 = vpop.eup %2542  ;;  %vm1544_vm8 = vweird.f32 %v2541_v27  ;;  %v3634_v47 = vld [vmem:[#allocation8 + $0x128] sm:$0xff]  ;;  %v3668_v22 = vld [vmem:[#allocation8 + $0xc0] sm:$0xff] }
 0x3ba   :  { %v1507_v38 = vsel %vm1506_vm4, %v2537_v35, %v1503_v28  ;;  %vm1545_vm10 = vmor %vm1543_vm9, %vm1544_vm8  ;;  %v3636_v35 = vld [vmem:[#allocation8 + $0x130] sm:$0xff]  ;;  %1877 = vmatpush.msrb.mxu1 %v3634_v47  ;;  %v3983_v28 = vld [vmem:[#allocation24_spill] sm:$0xff] }
 0x3bb   :  { %v1512_v52 = vsel %vm1509_vm6, %v1511_v31, %v1507_v38  ;;  %v1526_v59 = vsel %vm1525_vm5, %v2539_v48, %v1522_v45  ;;  %v1540_v12 = vsub.f32 1.0, %v1539_v54  ;;  %1897 = vmatpush.msrb.mxu2 %v3636_v35  ;;  %v3646_v48 = vld [vmem:[#allocation8 + $0x108] sm:$0xff]  ;;  %v3682_v38 = vld [vmem:[#allocation8 + $0xa0] sm:$0xff] }
 0x3bc   :  { %v1531_v0 = vsel %vm1528_vm7, %v1530_v60, %v1526_v59  ;;  %v1554_v6 = vmul.f32 %v2543_v17, %v1512_v52  ;;  %1878 = vmatpush.msrb.mxu1 %v3646_v48  ;;  %v3984_v45 = vld [vmem:[#allocation25_spill] sm:$0xff]  ;;  %v3678_v60 = vld [vmem:[#allocation8 + $0xd8] sm:$0xff] }
 0x3bd   :  { %v1553_v11 = vmul.f32 %v1531_v0, %v3549_v1  ;;  %v1541_v16 = vmul.f32 %v2541_v27, %v1540_v12  ;;  %v3560_v1 = vld [vmem:[#allocation8 + $0x1e0] sm:$0xff]  ;;  %1898 = vmatpush.msrb.mxu2 %v3648_v7  ;;  %1920 = vmatpush.msrb.mxu3 %v3678_v60  ;;  %v3684_v17 = vld [vmem:[#allocation8 + $0xa8] sm:$0xff]  ;;  %v3686_v52 = vld [vmem:[#allocation8 + $0xb0] sm:$0xff] }
 0x3be   :  { %1851 = vmatpush.msrb.mxu0 %v3560_v1  ;;  %1879 = vmatpush.msrb.mxu1 %v3658_v8  ;;  %v3690_v0 = vld [vmem:[#allocation8 + $0xb8] sm:$0xff] }
 0x3bf   :  { %v3557_v40 = vadd.f32 %v1554_v6, %v1553_v11  ;;  %v1542_v13 = vadd.f32 %v2541_v27, %v1541_v16  ;;  %1899 = vmatpush.msrb.mxu2 %v3660_v10  ;;  %1921 = vmatpush.msrb.mxu3 %v3690_v0  ;;  %v3694_v6 = vld [vmem:[#allocation8 + $0x80] sm:$0xff]  ;;  %v3696_v11 = vld [vmem:[#allocation8 + $0x88] sm:$0xff]  ;;  %v3698_v16 = vld [vmem:[#allocation8 + $0x90] sm:$0xff] }
 0x3c0   :  { %1852 = vmatpush.msrb.mxu0 %v3572_v58  ;;  %1880 = vmatpush.msrb.mxu1 %v3670_v24 }
 0x3c1   :  { %2544 = vtanh.f32 %v3557_v40  ;;  %v1546_v32 = vsel %vm1545_vm10, %v2541_v27, %v1542_v13  ;;  %v3672_v27 = vld [vmem:[#allocation8 + $0xd0] sm:$0xff]  ;;  %v3702_v13 = vld [vmem:[#allocation8 + $0x98] sm:$0xff] }
 0x3c2   :  { %v1551_v33 = vsel %vm1548_vm11, %v1550_v57, %v1546_v32  ;;  %1853 = vmatpush.msrb.mxu0 %v3584_v42  ;;  %1900 = vmatpush.msrb.mxu2 %v3672_v27  ;;  %v3710_v32 = vld [vmem:[#allocation8 + $0x70] sm:$0xff]  ;;  %v3712_v57 = vld [vmem:[#allocation8 + $0x78] sm:$0xff] }
 0x3c3   :  { %1881 = vmatpush.msrb.mxu1 %v3684_v17  ;;  %1922 = vmatpush.msrb.mxu3 %v3702_v13  ;;  %3987 = vst [vmem:[#allocation51_spill] sm:$0xff] %v3710_v32 }
 0x3c4   :  { %1854 = vmatpush.msrb.mxu0 %v3596_v51  ;;  %1901 = vmatpush.msrb.mxu2 %v3686_v52  ;;  %3988 = vst [vmem:[#allocation52_spill] sm:$0xff] %v3712_v57 }
 0x3c5   :  { %1882 = vmatpush.msrb.mxu1 %v3696_v11  ;;  %1923 = vmatpush.msrb.mxu3 %v3712_v57 }
 0x3c6   :  { %1855 = vmatpush.msrb.mxu0 %v3608_v21  ;;  %1902 = vmatpush.msrb.mxu2 %v3698_v16 }
 0x3c7   :  { %v2545_v30 = vpop.eup %2544  ;;  %1883 = vmatpush.msrb.mxu1 %v3706_v9 }
 0x3c8   :  { %v1557_v55 = vmul.f32 %v2545_v30, %v1551_v33  ;;  %1856 = vmatpush.msrb.mxu0 %v3620_v29  ;;  %v3714_v30 = vld [vmem:[#allocation8 + $0x40] sm:$0xff]  ;;  %1903 = vmatpush.msrb.mxu2 %v3710_v32 }
 0x3c9   :  { %3989 = vst [vmem:[#allocation53_spill] sm:$0xff] %v3714_v30 }
 0x3ca   :  { %1559 = vst [vmem:[#allocation11 + $0x20] sm:$0xff] %v1557_v55  ;;  %1647 = vmatmul.f32.vlgmr.msra.gmra.mxu0 %v1557_v55  ;;  %1667 = vmatmul.f32.vlgmr.msra.gmra.mxu1 %v1557_v55 }
 0x3cb   :  { %1687 = vmatmul.f32.vlgmr.msra.gmra.mxu2 %v1557_v55  ;;  %1707 = vmatmul.f32.vlgmr.msra.gmra.mxu3 %v1557_v55  ;;  %v3718_v55 = vld [vmem:[#allocation8 + $0x48] sm:$0xff] }
 0x3cc   :  { %1857 = vmatpush.msrb.mxu0 %v3632_v36  ;;  %3990 = vst [vmem:[#allocation54_spill] sm:$0xff] %v3718_v55  ;;  %1884 = vmatpush.msrb.mxu1 %v3718_v55  ;;  %v3747_v55 = vld [vmem:[#allocation8 + $0x18] sm:$0xff] }
 0x3ce   :  { %1858 = vmatpush.msrb.mxu0 %v3644_v62 }
 0x3d0   :  { %1859 = vmatpush.msrb.mxu0 %v3656_v3 }
 0x3d2   :  { %1860 = vmatpush.msrb.mxu0 %v3668_v22 }
 0x3d4   :  { %1861 = vmatpush.msrb.mxu0 %v3682_v38 }
 0x3d6   :  { %1862 = vmatpush.msrb.mxu0 %v3694_v6 }
 0x3d8   :  { %1863 = vmatpush.msrb.mxu0 %v3704_v56 }
 0x3da   :  { %1864 = vmatpush.msrb.mxu0 %v3714_v30  ;;  %v3745_v30 = vld [vmem:[#allocation8 + $0x10] sm:$0xff] }
 0x447   :  { %v1648_v18 = vpop.f32.mrf.mxu0  ;;  %v1668_v19 = vpop.f32.mrf.mxu1 }
 0x448   :  { %v1711_v31 = vadd.f32 %v1648_v18, %v3983_v28  ;;  %v1712_v54 = vadd.f32 %v1668_v19, %v3984_v45  ;;  %v3720_v18 = vld [vmem:[#allocation8 + $0x50] sm:$0xff]  ;;  %v3722_v19 = vld [vmem:[#allocation8 + $0x58] sm:$0xff]  ;;  %v3727_v45 = vld [vmem:[#allocation8 + $0x20] sm:$0xff] }
 0x449   :  { %v3991_v28 = vld [vmem:[#allocation27_spill] sm:$0xff]  ;;  %1904 = vmatpush.msrb.mxu2 %v3720_v18  ;;  %1924 = vmatpush.msrb.mxu3 %v3722_v19 }
 0x44a   :  { %v2407_v59 = vmul.f32 -1.442695, %v1711_v31  ;;  %v2408_v12 = vmul.f32 -1.442695, %v1712_v54  ;;  %v3729_v54 = vld [vmem:[#allocation8 + $0x28] sm:$0xff]  ;;  %1865 = vmatpush.msrb.mxu0 %v3727_v45 }
 0x44b   :  { %1885 = vmatpush.msrb.mxu1 %v3729_v54 }
 0x44c   :  { %2546 = vpow2.f32 %v2407_v59  ;;  %v3733_v59 = vld [vmem:[#allocation8 + $0x30] sm:$0xff] }
 0x44d   :  { %2548 = vpow2.f32 %v2408_v12  ;;  %v3735_v12 = vld [vmem:[#allocation8 + $0x38] sm:$0xff]  ;;  %1905 = vmatpush.msrb.mxu2 %v3733_v59 }
 0x44e   :  { %v1708_v33 = vpop.f32.mrf.mxu3  ;;  %1925 = vmatpush.msrb.mxu3 %v3735_v12 }
 0x44f   :  { %v1714_v31 = vadd.f32 %v1708_v33, %v3991_v28  ;;  %v3739_v33 = vld [vmem:[#allocation8] sm:$0xff]  ;;  %v3741_v28 = vld [vmem:[#allocation8 + $0x8] sm:$0xff]  ;;  %1906 = vmatpush.msrb.mxu2 %v3745_v30 }
 0x450   :  { %1866 = vmatpush.msrb.mxu0 %v3739_v33  ;;  %1886 = vmatpush.msrb.mxu1 %v3741_v28 }
 0x451   :  { %v2409_v9 = vmul.f32 -1.442695, %v1714_v31  ;;  %1926 = vmatpush.msrb.mxu3 %v3747_v55  ;;  %2111 = vmatpush.msra.mxu2 %v3564_v25 }
 0x452   :  { %v2547_v57 = vpop.eup %2546  ;;  %2071 = vmatpush.msra.mxu0 %v3560_v1  ;;  %2091 = vmatpush.msra.mxu1 %v3562_v41  ;;  %v3992_v41 = vld [vmem:[#allocation26_spill] sm:$0xff] }
 0x453   :  { %v2549_v32 = vpop.eup %2548  ;;  %v3749_v56 = vadd.f32 1.0, %v2547_v57  ;;  %2550 = vpow2.f32 %v2409_v9  ;;  %2131 = vmatpush.msra.mxu3 %v3568_v34  ;;  %v1688_v9 = vpop.f32.mrf.mxu2  ;;  %2112 = vmatpush.msra.mxu2 %v3576_v37 }
 0x454   :  { %v3753_v31 = vadd.f32 1.0, %v2549_v32  ;;  %2072 = vmatpush.msra.mxu0 %v3572_v58  ;;  %2092 = vmatpush.msra.mxu1 %v3574_v14  ;;  %v1713_v25 = vadd.f32 %v1688_v9, %v3992_v41 }
 0x455   :  { %2552 = vrcp.f32 %v3749_v56  ;;  %2132 = vmatpush.msra.mxu3 %v3580_v44  ;;  %2113 = vmatpush.msra.mxu2 %v3588_v49  ;;  %vm1724_vm14 = vweird.f32 %v3749_v56 }
 0x456   :  { %2554 = vrcp.f32 %v3753_v31  ;;  %2073 = vmatpush.msra.mxu0 %v3584_v42  ;;  %2093 = vmatpush.msra.mxu1 %v3586_v43  ;;  %v1730_v42 = vand.u32 2147483648, %v3749_v56  ;;  %v1749_v43 = vand.u32 2147483648, %v3753_v31  ;;  %vm1743_vm15 = vweird.f32 %v3753_v31 }
 0x457   :  { %2133 = vmatpush.msra.mxu3 %v3592_v50  ;;  %2114 = vmatpush.msra.mxu2 %v3600_v20  ;;  %v1728_v50 = vand.u32 2147483647, %v3749_v56 }
 0x458   :  { %2074 = vmatpush.msra.mxu0 %v3596_v51  ;;  %2094 = vmatpush.msra.mxu1 %v3598_v53  ;;  %v1747_v53 = vand.u32 2147483647, %v3753_v31 }
 0x459   :  { %v2551_v32 = vpop.eup %2550  ;;  %2134 = vmatpush.msra.mxu3 %v3604_v5  ;;  %2115 = vmatpush.msra.mxu2 %v3612_v26  ;;  %vm1729_vm2 = vcmp.eq.f32.partialorder %v1728_v50, 8.507059e+37 }
 0x45a   :  { %v3769_v57 = vadd.f32 1.0, %v2551_v32  ;;  %2075 = vmatpush.msra.mxu0 %v3608_v21  ;;  %2095 = vmatpush.msra.mxu1 %v3610_v23  ;;  %v1731_v21 = vor.u32 1.1754944e-38, %v1730_v42  ;;  %vm1748_vm3 = vcmp.eq.f32.partialorder %v1747_v53, 8.507059e+37 }
 0x45b   :  { %v2553_v1 = vpop.eup %2552  ;;  %2135 = vmatpush.msra.mxu3 %v3616_v4  ;;  %2116 = vmatpush.msra.mxu2 %v3624_v61  ;;  %v1750_v4 = vor.u32 1.1754944e-38, %v1749_v43 }
 0x45c   :  { %v2555_v34 = vpop.eup %2554  ;;  %v1720_v58 = vmul.f32 %v2553_v1, %v3749_v56  ;;  %2556 = vrcp.f32 %v3769_v57  ;;  %vm1725_vm12 = vweird.f32 %v2553_v1  ;;  %2076 = vmatpush.msra.mxu0 %v3620_v29  ;;  %2096 = vmatpush.msra.mxu1 %v3622_v63  ;;  %vm1763_vm5 = vweird.f32 %v3769_v57 }
 0x45d   :  { %v1739_v14 = vmul.f32 %v2555_v34, %v3753_v31  ;;  %2558 = vtanh.f32 %v1713_v25  ;;  %vm1744_vm13 = vweird.f32 %v2555_v34  ;;  %2136 = vmatpush.msra.mxu3 %v3628_v15  ;;  %vm1726_vm0 = vmor %vm1724_vm14, %vm1725_vm12  ;;  %2117 = vmatpush.msra.mxu2 %v3636_v35 }
 0x45e   :  { %v1721_v37 = vsub.f32 1.0, %v1720_v58  ;;  %2077 = vmatpush.msra.mxu0 %v3632_v36  ;;  %2097 = vmatpush.msra.mxu1 %v3634_v47  ;;  %vm1745_vm1 = vmor %vm1743_vm15, %vm1744_vm13 }
 0x45f   :  { %v1740_v44 = vsub.f32 1.0, %v1739_v14  ;;  %2137 = vmatpush.msra.mxu3 %v3640_v39  ;;  %2118 = vmatpush.msra.mxu2 %v3648_v7  ;;  %v1769_v7 = vand.u32 2147483648, %v3769_v57 }
 0x460   :  { %v1722_v49 = vmul.f32 %v2553_v1, %v1721_v37  ;;  %2078 = vmatpush.msra.mxu0 %v3644_v62  ;;  %2098 = vmatpush.msra.mxu1 %v3646_v48 }
 0x461   :  { %v1741_v51 = vmul.f32 %v2555_v34, %v1740_v44  ;;  %2138 = vmatpush.msra.mxu3 %v3652_v2  ;;  %2119 = vmatpush.msra.mxu2 %v3660_v10  ;;  %v1767_v2 = vand.u32 2147483647, %v3769_v57  ;;  %v3994_v10 = vld [vmem:[#allocation50_spill] sm:$0xff] }
 0x462   :  { %v3795_v20 = vpop.eup %2556  ;;  %v1723_v5 = vadd.f32 %v2553_v1, %v1722_v49  ;;  %2079 = vmatpush.msra.mxu0 %v3656_v3  ;;  %2099 = vmatpush.msra.mxu1 %v3658_v8  ;;  %v3993_v8 = vld [vmem:[#allocation49_spill] sm:$0xff] }
 0x463   :  { %v1742_v23 = vadd.f32 %v2555_v34, %v1741_v51  ;;  %v1759_v26 = vmul.f32 %v3795_v20, %v3769_v57  ;;  %v2559_v63 = vpop.eup %2558  ;;  %2139 = vmatpush.msra.mxu3 %v3664_v46  ;;  %2120 = vmatpush.msra.mxu2 %v3672_v27  ;;  %vm1764_vm4 = vweird.f32 %v3795_v20  ;;  %v1770_v46 = vor.u32 1.1754944e-38, %v1769_v7  ;;  %v3997_v27 = vld [vmem:[#allocation53_spill] sm:$0xff] }
 0x464   :  { %v1727_v29 = vsel %vm1726_vm0, %v2553_v1, %v1723_v5  ;;  %2080 = vmatpush.msra.mxu0 %v3668_v22  ;;  %2100 = vmatpush.msra.mxu1 %v3670_v24  ;;  %vm1765_vm6 = vmor %vm1763_vm5, %vm1764_vm4  ;;  %v3995_v22 = vld [vmem:[#allocation51_spill] sm:$0xff]  ;;  %v3996_v24 = vld [vmem:[#allocation52_spill] sm:$0xff]  ;;  %vm1768_vm7 = vcmp.eq.f32.partialorder %v1767_v2, 8.507059e+37 }
 0x465   :  { %v1732_v61 = vsel %vm1729_vm2, %v1731_v21, %v1727_v29  ;;  %v1746_v15 = vsel %vm1745_vm1, %v2555_v34, %v1742_v23  ;;  %v1760_v36 = vsub.f32 1.0, %v1759_v26  ;;  %2140 = vmatpush.msra.mxu3 %v3678_v60  ;;  %2121 = vmatpush.msra.mxu2 %v3686_v52  ;;  %v3998_v60 = vld [vmem:[#allocation54_spill] sm:$0xff] }
 0x466   :  { %v1751_v47 = vsel %vm1748_vm3, %v1750_v4, %v1746_v15  ;;  %v1774_v35 = vmul.f32 %v2559_v63, %v1732_v61  ;;  %2081 = vmatpush.msra.mxu0 %v3682_v38  ;;  %2101 = vmatpush.msra.mxu1 %v3684_v17  ;;  %v4002_v1 = vld [vmem:[#allocation30_spill] sm:$0xff] }
 0x467   :  { %v1773_v39 = vmul.f32 %v1751_v47, %v3557_v40  ;;  %v1761_v62 = vmul.f32 %v3795_v20, %v1760_v36  ;;  %2141 = vmatpush.msra.mxu3 %v3690_v0  ;;  %2122 = vmatpush.msra.mxu2 %v3698_v16 }
 0x468   :  { %2082 = vmatpush.msra.mxu0 %v3694_v6  ;;  %2102 = vmatpush.msra.mxu1 %v3696_v11  ;;  %v3999_v11 = vld [vmem:[#allocation28_spill] sm:$0xff] }
 0x469   :  { %v3819_v48 = vadd.f32 %v1774_v35, %v1773_v39  ;;  %v1762_v40 = vadd.f32 %v3795_v20, %v1761_v62  ;;  %2142 = vmatpush.msra.mxu3 %v3702_v13  ;;  %2123 = vmatpush.msra.mxu2 %v3995_v22  ;;  %v4000_v13 = vld [vmem:[#allocation29_spill] sm:$0xff] }
 0x46a   :  { %2083 = vmatpush.msra.mxu0 %v3993_v8  ;;  %2103 = vmatpush.msra.mxu1 %v3994_v10 }
 0x46b   :  { %2560 = vtanh.f32 %v3819_v48  ;;  %v1766_v3 = vsel %vm1765_vm6, %v3795_v20, %v1762_v40  ;;  %2143 = vmatpush.msra.mxu3 %v3996_v24  ;;  %2124 = vmatpush.msra.mxu2 %v3720_v18 }
 0x46c   :  { %2084 = vmatpush.msra.mxu0 %v3997_v27  ;;  %2104 = vmatpush.msra.mxu1 %v3998_v60  ;;  %v1771_v17 = vsel %vm1768_vm7, %v1770_v46, %v1766_v3  ;;  %v4003_v27 = vld [vmem:[#allocation32_spill] sm:$0xff] }
 0x46d   :  { %2144 = vmatpush.msra.mxu3 %v3722_v19  ;;  %2125 = vmatpush.msra.mxu2 %v3733_v59 }
 0x46e   :  { %2085 = vmatpush.msra.mxu0 %v3727_v45  ;;  %2105 = vmatpush.msra.mxu1 %v3729_v54  ;;  %v4001_v54 = vld [vmem:[#allocation31_spill] sm:$0xff] }
 0x46f   :  { %2145 = vmatpush.msra.mxu3 %v3735_v12  ;;  %2126 = vmatpush.msra.mxu2 %v3745_v30 }
 0x470   :  { %2086 = vmatpush.msra.mxu0 %v3739_v33  ;;  %2106 = vmatpush.msra.mxu1 %v3741_v28 }
 0x471   :  { %v2561_v38 = vpop.eup %2560  ;;  %2146 = vmatpush.msra.mxu3 %v3747_v55 }
 0x472   :  { %v1777_v52 = vmul.f32 %v2561_v38, %v1771_v17  ;;  %v4004_v38 = vld [vmem:[#allocation33_spill] sm:$0xff] }
 0x474   :  { %1779 = vst [vmem:[#allocation11 + $0x28] sm:$0xff] %v1777_v52  ;;  %1867 = vmatmul.f32.vlgmr.msrb.gmra.mxu0 %v1777_v52  ;;  %1887 = vmatmul.f32.vlgmr.msrb.gmra.mxu1 %v1777_v52 }
 0x475   :  { %1907 = vmatmul.f32.vlgmr.msrb.gmra.mxu2 %v1777_v52  ;;  %1927 = vmatmul.f32.vlgmr.msrb.gmra.mxu3 %v1777_v52 }
 0x4f1   :  { %v1868_v0 = vpop.f32.mrf.mxu0  ;;  %v1888_v6 = vpop.f32.mrf.mxu1 }
 0x4f2   :  { %v1931_v16 = vadd.f32 %v1868_v0, %v3999_v11  ;;  %v1932_v56 = vadd.f32 %v1888_v6, %v4000_v13  ;;  %v4005_v11 = vld [vmem:[#allocation35_spill] sm:$0xff] }
 0x4f4   :  { %v2410_v18 = vmul.f32 -1.442695, %v1931_v16  ;;  %v2411_v19 = vmul.f32 -1.442695, %v1932_v56 }
 0x4f6   :  { %2562 = vpow2.f32 %v2410_v18 }
 0x4f7   :  { %2564 = vpow2.f32 %v2411_v19 }
 0x4f8   :  { %v1928_v45 = vpop.f32.mrf.mxu3  ;;  %v1908_v55 = vpop.f32.mrf.mxu2 }
 0x4f9   :  { %v1934_v59 = vadd.f32 %v1928_v45, %v4001_v54  ;;  %v1933_v41 = vadd.f32 %v1908_v55, %v4002_v1 }
 0x4fb   :  { %v2412_v12 = vmul.f32 -1.442695, %v1934_v59 }
 0x4fc   :  { %v2563_v33 = vpop.eup %2562 }
 0x4fd   :  { %v2565_v28 = vpop.eup %2564  ;;  %v1938_v31 = vadd.f32 1.0, %v2563_v33  ;;  %2566 = vpow2.f32 %v2412_v12 }
 0x4fe   :  { %v1957_v30 = vadd.f32 1.0, %v2565_v28  ;;  %v4006_v28 = vld [vmem:[#allocation34_spill] sm:$0xff] }
 0x4ff   :  { %2568 = vrcp.f32 %v1938_v31  ;;  %v1950_v44 = vand.u32 2147483648, %v1938_v31  ;;  %v1948_v49 = vand.u32 2147483647, %v1938_v31  ;;  %vm1944_vm10 = vweird.f32 %v1938_v31 }
 0x500   :  { %2570 = vrcp.f32 %v1957_v30  ;;  %v1969_v42 = vand.u32 2147483648, %v1957_v30  ;;  %v1967_v51 = vand.u32 2147483647, %v1957_v30  ;;  %vm1963_vm11 = vweird.f32 %v1957_v30 }
 0x501   :  { %v1951_v5 = vor.u32 1.1754944e-38, %v1950_v44  ;;  %vm1949_vm14 = vcmp.eq.f32.partialorder %v1948_v49, 8.507059e+37 }
 0x502   :  { %v1970_v26 = vor.u32 1.1754944e-38, %v1969_v42  ;;  %vm1968_vm15 = vcmp.eq.f32.partialorder %v1967_v51, 8.507059e+37 }
 0x503   :  { %v2567_v9 = vpop.eup %2566 }
 0x504   :  { %v1977_v32 = vadd.f32 1.0, %v2567_v9 }
 0x505   :  { %v2569_v57 = vpop.eup %2568 }
 0x506   :  { %v2571_v25 = vpop.eup %2570  ;;  %v1940_v34 = vmul.f32 %v2569_v57, %v1938_v31  ;;  %2572 = vrcp.f32 %v1977_v32  ;;  %vm1945_vm8 = vweird.f32 %v2569_v57  ;;  %v1989_v7 = vand.u32 2147483648, %v1977_v32 }
 0x507   :  { %v1959_v58 = vmul.f32 %v2571_v25, %v1957_v30  ;;  %2574 = vtanh.f32 %v1933_v41  ;;  %vm1964_vm9 = vweird.f32 %v2571_v25  ;;  %vm1946_vm12 = vmor %vm1944_vm10, %vm1945_vm8  ;;  %vm1983_vm1 = vweird.f32 %v1977_v32 }
 0x508   :  { %v1941_v14 = vsub.f32 1.0, %v1940_v34  ;;  %vm1965_vm13 = vmor %vm1963_vm11, %vm1964_vm9  ;;  %v1987_v2 = vand.u32 2147483647, %v1977_v32  ;;  %v1990_v8 = vor.u32 1.1754944e-38, %v1989_v7 }
 0x509   :  { %v1960_v37 = vsub.f32 1.0, %v1959_v58 }
 0x50a   :  { %v1942_v43 = vmul.f32 %v2569_v57, %v1941_v14  ;;  %vm1988_vm3 = vcmp.eq.f32.partialorder %v1987_v2, 8.507059e+37 }
 0x50b   :  { %v1961_v50 = vmul.f32 %v2571_v25, %v1960_v37 }
 0x50c   :  { %v2573_v53 = vpop.eup %2572  ;;  %v1943_v20 = vadd.f32 %v2569_v57, %v1942_v43 }
 0x50d   :  { %v1962_v21 = vadd.f32 %v2571_v25, %v1961_v50  ;;  %v1979_v23 = vmul.f32 %v2573_v53, %v1977_v32  ;;  %v2575_v29 = vpop.eup %2574  ;;  %vm1984_vm0 = vweird.f32 %v2573_v53 }
 0x50e   :  { %v1947_v4 = vsel %vm1946_vm12, %v2569_v57, %v1943_v20  ;;  %vm1985_vm2 = vmor %vm1983_vm1, %vm1984_vm0 }
 0x50f   :  { %v1952_v63 = vsel %vm1949_vm14, %v1951_v5, %v1947_v4  ;;  %v1966_v61 = vsel %vm1965_vm13, %v2571_v25, %v1962_v21  ;;  %v1980_v15 = vsub.f32 1.0, %v1979_v23 }
 0x510   :  { %v1971_v36 = vsel %vm1968_vm15, %v1970_v26, %v1966_v61  ;;  %v1994_v47 = vmul.f32 %v2575_v29, %v1952_v63 }
 0x511   :  { %v1993_v35 = vmul.f32 %v1971_v36, %v3819_v48  ;;  %v1981_v39 = vmul.f32 %v2573_v53, %v1980_v15 }
 0x513   :  { %v3859_v62 = vadd.f32 %v1994_v47, %v1993_v35  ;;  %v1982_v40 = vadd.f32 %v2573_v53, %v1981_v39 }
 0x515   :  { %2576 = vtanh.f32 %v3859_v62  ;;  %v1986_v3 = vsel %vm1985_vm2, %v2573_v53, %v1982_v40 }
 0x516   :  { %v1991_v46 = vsel %vm1988_vm3, %v1990_v8, %v1986_v3 }
 0x51b   :  { %v2577_v10 = vpop.eup %2576 }
 0x51c   :  { %v1997_v22 = vmul.f32 %v2577_v10, %v1991_v46 }
 0x51e   :  { %1999 = vst [vmem:[#allocation11 + $0x30] sm:$0xff] %v1997_v22  ;;  %2087 = vmatmul.f32.vlgmr.msra.gmra.mxu0 %v1997_v22  ;;  %2107 = vmatmul.f32.vlgmr.msra.gmra.mxu1 %v1997_v22 }
 0x51f   :  { %2127 = vmatmul.f32.vlgmr.msra.gmra.mxu2 %v1997_v22  ;;  %2147 = vmatmul.f32.vlgmr.msra.gmra.mxu3 %v1997_v22 }
 0x59b   :  { %v2088_v48 = vpop.f32.mrf.mxu0  ;;  %v2108_v24 = vpop.f32.mrf.mxu1 }
 0x59c   :  { %v2151_v60 = vadd.f32 %v2088_v48, %v4003_v27  ;;  %v2152_v17 = vadd.f32 %v2108_v24, %v4004_v38 }
 0x59e   :  { %v2413_v52 = vmul.f32 -1.442695, %v2151_v60  ;;  %v2414_v0 = vmul.f32 -1.442695, %v2152_v17 }
 0x5a0   :  { %2578 = vpow2.f32 %v2413_v52 }
 0x5a1   :  { %2580 = vpow2.f32 %v2414_v0 }
 0x5a2   :  { %v2148_v6 = vpop.f32.mrf.mxu3  ;;  %v2128_v54 = vpop.f32.mrf.mxu2 }
 0x5a3   :  { %v2154_v16 = vadd.f32 %v2148_v6, %v4005_v11  ;;  %v2153_v31 = vadd.f32 %v2128_v54, %v4006_v28 }
 0x5a5   :  { %v2415_v13 = vmul.f32 -1.442695, %v2154_v16 }
 0x5a6   :  { %v2579_v56 = vpop.eup %2578 }
 0x5a7   :  { %v2581_v18 = vpop.eup %2580  ;;  %v2158_v19 = vadd.f32 1.0, %v2579_v56  ;;  %2582 = vpow2.f32 %v2415_v13 }
 0x5a8   :  { %v2177_v45 = vadd.f32 1.0, %v2581_v18 }
 0x5a9   :  { %2584 = vrcp.f32 %v2158_v19  ;;  %v2170_v1 = vand.u32 2147483648, %v2158_v19  ;;  %v2168_v34 = vand.u32 2147483647, %v2158_v19  ;;  %vm2164_vm6 = vweird.f32 %v2158_v19 }
 0x5aa   :  { %2586 = vrcp.f32 %v2177_v45  ;;  %v2189_v41 = vand.u32 2147483648, %v2177_v45  ;;  %v2187_v14 = vand.u32 2147483647, %v2177_v45  ;;  %vm2183_vm7 = vweird.f32 %v2177_v45 }
 0x5ab   :  { %v2171_v42 = vor.u32 1.1754944e-38, %v2170_v1  ;;  %vm2169_vm10 = vcmp.eq.f32.partialorder %v2168_v34, 8.507059e+37 }
 0x5ac   :  { %v2190_v50 = vor.u32 1.1754944e-38, %v2189_v41  ;;  %vm2188_vm11 = vcmp.eq.f32.partialorder %v2187_v14, 8.507059e+37 }
 0x5ad   :  { %v2583_v59 = vpop.eup %2582 }
 0x5ae   :  { %v2197_v12 = vadd.f32 1.0, %v2583_v59 }
 0x5af   :  { %v2585_v33 = vpop.eup %2584 }
 0x5b0   :  { %v2587_v30 = vpop.eup %2586  ;;  %v2160_v55 = vmul.f32 %v2585_v33, %v2158_v19  ;;  %2588 = vrcp.f32 %v2197_v12  ;;  %vm2165_vm4 = vweird.f32 %v2585_v33  ;;  %v2209_v15 = vand.u32 2147483648, %v2197_v12 }
 0x5b1   :  { %v2179_v9 = vmul.f32 %v2587_v30, %v2177_v45  ;;  %2590 = vtanh.f32 %v2153_v31  ;;  %vm2184_vm5 = vweird.f32 %v2587_v30  ;;  %vm2166_vm8 = vmor %vm2164_vm6, %vm2165_vm4  ;;  %vm2203_vm13 = vweird.f32 %v2197_v12 }
 0x5b2   :  { %v2161_v32 = vsub.f32 1.0, %v2160_v55  ;;  %vm2185_vm9 = vmor %vm2183_vm7, %vm2184_vm5  ;;  %v2207_v36 = vand.u32 2147483647, %v2197_v12  ;;  %v2210_v35 = vor.u32 1.1754944e-38, %v2209_v15 }
 0x5b3   :  { %v2180_v57 = vsub.f32 1.0, %v2179_v9 }
 0x5b4   :  { %v2162_v25 = vmul.f32 %v2585_v33, %v2161_v32  ;;  %vm2208_vm15 = vcmp.eq.f32.partialorder %v2207_v36, 8.507059e+37 }
 0x5b5   :  { %v2181_v58 = vmul.f32 %v2587_v30, %v2180_v57 }
 0x5b6   :  { %v2589_v37 = vpop.eup %2588  ;;  %v2163_v44 = vadd.f32 %v2585_v33, %v2162_v25 }
 0x5b7   :  { %v2182_v43 = vadd.f32 %v2587_v30, %v2181_v58  ;;  %v2199_v49 = vmul.f32 %v2589_v37, %v2197_v12  ;;  %v2591_v53 = vpop.eup %2590  ;;  %vm2204_vm12 = vweird.f32 %v2589_v37 }
 0x5b8   :  { %v2167_v51 = vsel %vm2166_vm8, %v2585_v33, %v2163_v44  ;;  %vm2205_vm14 = vmor %vm2203_vm13, %vm2204_vm12 }
 0x5b9   :  { %v2172_v20 = vsel %vm2169_vm10, %v2171_v42, %v2167_v51  ;;  %v2186_v5 = vsel %vm2185_vm9, %v2587_v30, %v2182_v43  ;;  %v2200_v21 = vsub.f32 1.0, %v2199_v49 }
 0x5ba   :  { %v2191_v23 = vsel %vm2188_vm11, %v2190_v50, %v2186_v5  ;;  %v2214_v26 = vmul.f32 %v2591_v53, %v2172_v20 }
 0x5bb   :  { %v2213_v4 = vmul.f32 %v2191_v23, %v3859_v62  ;;  %v2201_v29 = vmul.f32 %v2589_v37, %v2200_v21 }
 0x5bd   :  { %v2215_v63 = vadd.f32 %v2214_v26, %v2213_v4  ;;  %v2202_v61 = vadd.f32 %v2589_v37, %v2201_v29 }
 0x5bf   :  { %2592 = vtanh.f32 %v2215_v63  ;;  %v2206_v47 = vsel %vm2205_vm14, %v2589_v37, %v2202_v61 }
 0x5c0   :  { %v2211_v62 = vsel %vm2208_vm15, %v2210_v35, %v2206_v47 }
 0x5c5   :  { %v2593_v39 = vpop.eup %2592 }
 0x5c6   :  { %v2217_v40 = vmul.f32 %v2593_v39, %v2211_v62 }
 0x5c8   :  { %2219 = vst [vmem:[#allocation11 + $0x38] sm:$0xff] %v2217_v40 }
 0x5c9   :  { %2232 = dma.vmem_to_hbm [thread:$0]  %s2225_s3, 1024, %s2227_s15, [#allocation5], %s2734_s16, %s2734_s16, %s2735_s17  }
 0x5ca   :  { %2720 = dma.done.wait [#allocation5], 1024  }
 0x5cb   :  { %2721 = vsyncadd [#allocation5], 4294966272 }
 0x5cc   :  { %2237 = vsyncpa [#allocation4], 1 }
 0x5cd   :  { %2238 = vsyncpa [#allocation7], 1 }
 0x5ce   :  { %2239 = vsyncpa [#allocation10], 1 }
 0x5cf   :  { %2240 = vsyncpa [#allocation5], 1 }

</bundles_post_ra>
